<compile_context>
chip_gen: v7x
topology: tpu7x:2x2x1
jax: 0.10.0
libtpu: 0.0.40
codegen_flags: <defaults>
</compile_context>

<pallas_src>
import functools

import jax
import jax.numpy as jnp
from jax.experimental import pallas as pl
from jax.experimental.pallas import tpu as pltpu


LANE = 128
_VMEM_LIMIT = 32 * 1024 * 1024


def _round_up(x, m):
    return (x + m - 1) // m * m


# ----------------------------------------------------------------------------
# Kernel A (BN layers): tiled bf16 matmul -> f32 acc, plus per-channel sum/sumsq.
# grid = (m_tiles, k_tiles); K is the contraction axis (innermost, "arbitrary").
# Conv bias is intentionally omitted: it cancels exactly under train-mode BatchNorm.
# Zero-padded M rows / K columns contribute 0 to both the matmul and the stats.
# ----------------------------------------------------------------------------
def _mm_stats_kernel(x_ref, w_ref, y_ref, sum_ref, ssq_ref, acc_ref):
    k = pl.program_id(1)

    @pl.when(k == 0)
    def _():
        acc_ref[...] = jnp.zeros_like(acc_ref)

    acc_ref[...] += jnp.dot(x_ref[...], w_ref[...],
                            preferred_element_type=jnp.float32)

    @pl.when(k == pl.num_programs(1) - 1)
    def _():
        y = acc_ref[...]
        y_ref[...] = y
        sum_ref[...] = jnp.sum(y, axis=0, keepdims=True)
        ssq_ref[...] = jnp.sum(y * y, axis=0, keepdims=True)


# Kernel A (no-BN final conv): tiled matmul + bias.
def _mm_bias_kernel(x_ref, w_ref, b_ref, y_ref, acc_ref):
    k = pl.program_id(1)

    @pl.when(k == 0)
    def _():
        acc_ref[...] = jnp.zeros_like(acc_ref)

    acc_ref[...] += jnp.dot(x_ref[...], w_ref[...],
                            preferred_element_type=jnp.float32)

    @pl.when(k == pl.num_programs(1) - 1)
    def _():
        y_ref[...] = acc_ref[...] + b_ref[...]


# Kernel B: fused per-channel scale/shift (folded BN) + LeakyReLU; f32 math,
# output dtype chosen by the caller (bf16 when feeding the next conv layer).
def _scale_shift_act_kernel(y_ref, scale_ref, shift_ref, o_ref, *, slope, use_act):
    y = y_ref[...] * scale_ref[...] + shift_ref[...]
    if use_act:
        y = jnp.where(y >= 0.0, y, slope * y)
    o_ref[...] = y.astype(o_ref.dtype)


# ----------------------------------------------------------------------------
# pallas_call wrappers
# ----------------------------------------------------------------------------
def _matmul_stats(patches, w_mat, *, tm, tk):
    Mp, Kp = patches.shape
    Np = w_mat.shape[1]
    mt, kt = Mp // tm, Kp // tk
    cost = pl.CostEstimate(
        flops=2 * Mp * Kp * Np, transcendentals=0,
        bytes_accessed=Mp * Kp * 2 + Kp * Np * 2 + Mp * Np * 4)
    return pl.pallas_call(
        _mm_stats_kernel,
        out_shape=(jax.ShapeDtypeStruct((Mp, Np), jnp.float32),
                   jax.ShapeDtypeStruct((mt, 1, Np), jnp.float32),
                   jax.ShapeDtypeStruct((mt, 1, Np), jnp.float32)),
        grid=(mt, kt),
        in_specs=[
            pl.BlockSpec((tm, tk), lambda m, k: (m, k)),
            pl.BlockSpec((tk, Np), lambda m, k: (k, 0)),
        ],
        out_specs=(
            pl.BlockSpec((tm, Np), lambda m, k: (m, 0)),
            pl.BlockSpec((None, 1, Np), lambda m, k: (m, 0, 0)),
            pl.BlockSpec((None, 1, Np), lambda m, k: (m, 0, 0)),
        ),
        scratch_shapes=[pltpu.VMEM((tm, Np), jnp.float32)],
        compiler_params=pltpu.CompilerParams(
            dimension_semantics=("parallel", "arbitrary"),
            vmem_limit_bytes=_VMEM_LIMIT),
        cost_estimate=cost,
    )(patches, w_mat)


def _matmul_bias(patches, w_mat, bias, *, tm, tk):
    Mp, Kp = patches.shape
    Np = w_mat.shape[1]
    mt, kt = Mp // tm, Kp // tk
    cost = pl.CostEstimate(
        flops=2 * Mp * Kp * Np, transcendentals=0,
        bytes_accessed=Mp * Kp * 2 + Kp * Np * 2 + Mp * Np * 4)
    return pl.pallas_call(
        _mm_bias_kernel,
        out_shape=jax.ShapeDtypeStruct((Mp, Np), jnp.float32),
        grid=(mt, kt),
        in_specs=[
            pl.BlockSpec((tm, tk), lambda m, k: (m, k)),
            pl.BlockSpec((tk, Np), lambda m, k: (k, 0)),
            pl.BlockSpec((1, Np), lambda m, k: (0, 0)),
        ],
        out_specs=pl.BlockSpec((tm, Np), lambda m, k: (m, 0)),
        scratch_shapes=[pltpu.VMEM((tm, Np), jnp.float32)],
        compiler_params=pltpu.CompilerParams(
            dimension_semantics=("parallel", "arbitrary"),
            vmem_limit_bytes=_VMEM_LIMIT),
        cost_estimate=cost,
    )(patches, w_mat, bias)


def _scale_shift_act(y, scale, shift, *, tm, slope, use_act, out_dtype):
    Mp, Np = y.shape
    kern = functools.partial(_scale_shift_act_kernel, slope=slope, use_act=use_act)
    return pl.pallas_call(
        kern,
        out_shape=jax.ShapeDtypeStruct((Mp, Np), out_dtype),
        grid=(Mp // tm,),
        in_specs=[
            pl.BlockSpec((tm, Np), lambda m: (m, 0)),
            pl.BlockSpec((1, Np), lambda m: (0, 0)),
            pl.BlockSpec((1, Np), lambda m: (0, 0)),
        ],
        out_specs=pl.BlockSpec((tm, Np), lambda m: (m, 0)),
        compiler_params=pltpu.CompilerParams(
            dimension_semantics=("parallel",),
            vmem_limit_bytes=_VMEM_LIMIT),
    )(y, scale, shift)


# ----------------------------------------------------------------------------
# Glue: im2col (NHWC, bf16), per-layer wrapper, parameter init, forward pass
# ----------------------------------------------------------------------------
def extract_patches(x_nhwc, ksize, stride, pad):
    x = jnp.pad(x_nhwc.astype(jnp.bfloat16), ((0, 0), (pad, pad), (pad, pad), (0, 0)))
    n, h, w, c = x.shape
    ho = (h - ksize) // stride + 1
    wo = (w - ksize) // stride + 1
    cols = []
    for i in range(ksize):
        for j in range(ksize):
            cols.append(x[:, i:i + ho * stride:stride, j:j + wo * stride:stride, :])
    patches = jnp.concatenate(cols, axis=-1)          # (N, Ho, Wo, k*k*C) in (i, j, c) order
    return patches.reshape(n * ho * wo, ksize * ksize * c), (n, ho, wo)


def conv_layer(x_nhwc, w, b, gamma, beta, *, stride, pad, use_bn, use_act,
               out_dtype=jnp.float32, eps=1e-5, slope=0.2):
    c_out, c_in, kh, kw = w.shape
    # im2col in bf16 halves the HBM bytes of the patch blow-up; matmul accumulates in f32.
    # TODO(synk): gather patches in-kernel from the NHWC activation (manual DMA) to remove
    # the k*k im2col materialization entirely.
    patches, (n, ho, wo) = extract_patches(x_nhwc, kh, stride, pad)
    M, K = patches.shape

    # MXU/lane-friendly padding: Cout and K to multiples of 128, M to the M-tile.
    Np = _round_up(c_out, LANE)
    tk = min(512, _round_up(K, LANE))
    Kp = _round_up(K, tk)
    tm = min(256, _round_up(M, 8))
    Mp = _round_up(M, tm)

    patches_p = jnp.zeros((Mp, Kp), jnp.bfloat16).at[:M, :K].set(patches)
    # PyTorch weight (Cout, Cin, KH, KW) -> (KH*KW*Cin, Cout), matching patch (i, j, c) order.
    w_mat = jnp.transpose(w, (2, 3, 1, 0)).reshape(K, c_out)
    w_p = jnp.zeros((Kp, Np), jnp.bfloat16).at[:K, :c_out].set(w_mat.astype(jnp.bfloat16))

    if use_bn:
        # Phase 1: tiled matmul + per-tile channel sums (conv bias skipped: cancels in BN).
        y, psum, pssq = _matmul_stats(patches_p, w_p, tm=tm, tk=tk)
        # Tiny O(Cout) glue: fold batch stats + gamma/beta into one scale/shift FMA.
        total = jnp.sum(psum, axis=0)                               # (1, Np)
        total_sq = jnp.sum(pssq, axis=0)                            # (1, Np)
        mean = total / float(M)
        var = jnp.maximum(total_sq / float(M) - mean * mean, 0.0)   # biased var (train-mode BN)
        gamma_p = jnp.zeros((1, Np), jnp.float32).at[0, :c_out].set(gamma)
        beta_p = jnp.zeros((1, Np), jnp.float32).at[0, :c_out].set(beta)
        scale = gamma_p * jax.lax.rsqrt(var + eps)
        shift = beta_p - mean * scale
        # Phase 2: fused normalize + LeakyReLU over all M tiles.
        y = _scale_shift_act(y, scale, shift, tm=tm, slope=slope,
                             use_act=use_act, out_dtype=out_dtype)
    else:
        b_p = jnp.zeros((1, Np), jnp.float32).at[0, :c_out].set(b)
        y = _matmul_bias(patches_p, w_p, b_p, tm=tm, tk=tk)
        if use_act:  # not used by this model (final conv has no activation)
            y = jnp.where(y >= 0.0, y, slope * y)
        y = y.astype(out_dtype)

    y = y[:M, :c_out]
    return y.reshape(n, ho, wo, c_out)


def init_params(key, input_channels, num_filters):
    def conv_init(k, c_out, c_in, ksize):
        fan_in = c_in * ksize * ksize
        bound = 1.0 / float(fan_in) ** 0.5
        kw_, kb_ = jax.random.split(k)
        w = jax.random.uniform(kw_, (c_out, c_in, ksize, ksize), jnp.float32, -bound, bound)
        b = jax.random.uniform(kb_, (c_out,), jnp.float32, -bound, bound)
        return w, b

    keys = jax.random.split(key, 5)
    chans = [input_channels, num_filters, num_filters * 2, num_filters * 4, num_filters * 8]
    params = {}
    for i in range(4):
        w, b = conv_init(keys[i], chans[i + 1], chans[i], 4)
        params[f"conv{i + 1}"] = {
            "w": w, "b": b,
            "gamma": jnp.ones((chans[i + 1],), jnp.float32),   # BatchNorm2d default init
            "beta": jnp.zeros((chans[i + 1],), jnp.float32),
        }
    w, b = conv_init(keys[4], 1, chans[4], 4)
    params["final"] = {"w": w, "b": b}
    return params


def patch_discriminator_forward(params, x_nchw):
    x = jnp.transpose(x_nchw, (0, 2, 3, 1)).astype(jnp.float32)  # NCHW -> NHWC
    for idx in range(1, 5):
        p = params[f"conv{idx}"]
        # DownSampler: conv1..3 -> BN -> LeakyReLU ; conv4 -> BN only.
        # Intermediate activations kept in bf16 (they feed the next bf16 im2col).
        x = conv_layer(x, p["w"], p["b"], p["gamma"], p["beta"],
                       stride=2, pad=1, use_bn=True, use_act=(idx < 4),
                       out_dtype=jnp.bfloat16)
    p = params["final"]
    x = conv_layer(x, p["w"], p["b"], None, None,
                   stride=1, pad=1, use_bn=False, use_act=False,
                   out_dtype=jnp.float32)
    return jnp.transpose(x, (0, 3, 1, 2))  # NHWC -> NCHW


# ----------------------------------------------------------------------------
# Pure-JAX reference (PyTorch train-mode semantics) for a sanity check.
# ----------------------------------------------------------------------------
def _reference_forward(params, x_nchw, eps=1e-5, slope=0.2):
    def conv(x, w, b, stride, pad):
        y = jax.lax.conv_general_dilated(
            x, w, window_strides=(stride, stride),
            padding=[(pad, pad), (pad, pad)],
            dimension_numbers=("NCHW", "OIHW", "NCHW"))
        return y + b[None, :, None, None]

    def bn(x, gamma, beta):
        mean = jnp.mean(x, axis=(0, 2, 3), keepdims=True)
        var = jnp.mean((x - mean) ** 2, axis=(0, 2, 3), keepdims=True)
        xn = (x - mean) * jax.lax.rsqrt(var + eps)
        return gamma[None, :, None, None] * xn + beta[None, :, None, None]

    h = x_nchw
    for idx in range(1, 5):
        p = params[f"conv{idx}"]
        h = bn(conv(h, p["w"], p["b"], 2, 1), p["gamma"], p["beta"])
        if idx < 4:
            h = jnp.where(h >= 0.0, h, slope * h)
    p = params["final"]
    return conv(h, p["w"], p["b"], 1, 1)


# ----------------------------------------------------------------------------
if __name__ == "__main__":
    key = jax.random.PRNGKey(0)
    k_x, k_p = jax.random.split(key)

    # 32x32 is the smallest spatial size this architecture supports (32->16->8->4->2->1).
    batch, in_ch, spatial, nf = 2, 3, 32, 8
    x = jax.random.normal(k_x, (batch, in_ch, spatial, spatial), jnp.float32)
    params = init_params(k_p, in_ch, nf)

    fwd = jax.jit(patch_discriminator_forward)
    out = fwd(params, x)
    jax.block_until_ready(out)

    assert out.shape == (batch, 1, 1, 1), out.shape
    assert bool(jnp.all(jnp.isfinite(out)))

    ref = _reference_forward(params, x)
    err = float(jnp.max(jnp.abs(out - ref)))
    assert err < 0.3, f"max |kernel - reference| = {err}"

    print("KERNEL_OK")
</pallas_src>

<mosaic_0001>
module attributes {stable_mosaic.version = 11 : i64} {
  func.func @_mm_stats_kernel(%arg0: i32, %arg1: i32, %arg2: memref<256x128xbf16, #tpu.memory_space<vmem>>, %arg3: memref<128x128xbf16, #tpu.memory_space<vmem>>, %arg4: memref<256x128xf32, #tpu.memory_space<vmem>>, %arg5: memref<1x1x128xf32, #tpu.memory_space<vmem>>, %arg6: memref<1x1x128xf32, #tpu.memory_space<vmem>>, %arg7: memref<256x128xf32, #tpu.memory_space<vmem>>) attributes {dimension_semantics = [#tpu.dimension_semantics<parallel>, #tpu.dimension_semantics<arbitrary>], iteration_bounds = array<i64: 2, 1>, scalar_prefetch = 0 : i64, scratch_operands = 1 : i64, tpu.core_type = #tpu.core_type<tc>, window_params = [{transform_indices = @transform_0, window_bounds = array<i64: 256, 128>}, {transform_indices = @transform_1, window_bounds = array<i64: 128, 128>}, {transform_indices = @transform_2, window_bounds = array<i64: 256, 128>}, {transform_indices = @transform_3, window_bounds = array<i64: 1, 1, 128>}, {transform_indices = @transform_4, window_bounds = array<i64: 1, 1, 128>}]} {
    %c0_i32 = arith.constant 0 : i32
    %0 = arith.cmpi eq, %arg1, %c0_i32 : i32
    %1 = arith.extui %0 : i1 to i32
    %c0_i32_0 = arith.constant 0 : i32
    %2 = arith.cmpi ne, %1, %c0_i32_0 : i32
    scf.if %2 {
      %cst_10 = arith.constant 0.000000e+00 : f32
      %12 = vector.broadcast %cst_10 : f32 to vector<256x128xf32>
      %c0_11 = arith.constant 0 : index
      %c0_12 = arith.constant 0 : index
      %13 = vector.load %arg7[%c0_11, %c0_12] : memref<256x128xf32, #tpu.memory_space<vmem>>, vector<256x128xf32>
      tpu.vector_store %arg7[%c0_11, %c0_12], %12 {strides = array<i32>} : memref<256x128xf32, #tpu.memory_space<vmem>>, vector<256x128xf32>,
    } else {
    }
    %c0 = arith.constant 0 : index
    %c0_1 = arith.constant 0 : index
    %3 = vector.load %arg7[%c0, %c0_1] : memref<256x128xf32, #tpu.memory_space<vmem>>, vector<256x128xf32>
    %c0_2 = arith.constant 0 : index
    %c0_3 = arith.constant 0 : index
    %4 = vector.load %arg2[%c0_2, %c0_3] : memref<256x128xbf16, #tpu.memory_space<vmem>>, vector<256x128xbf16>
    %c0_4 = arith.constant 0 : index
    %c0_5 = arith.constant 0 : index
    %5 = vector.load %arg3[%c0_4, %c0_5] : memref<128x128xbf16, #tpu.memory_space<vmem>>, vector<128x128xbf16>
    %cst = arith.constant dense<0.000000e+00> : vector<256x128xf32>
    %6 = tpu.matmul %4, %5, %cst {dimension_numbers = #tpu.dot_dimension_numbers<[1], [0], [0], [1], [0, 0, 1, 1], [], []>} : vector<256x128xbf16>, vector<128x128xbf16>, vector<256x128xf32> -> vector<256x128xf32>
    %7 = arith.addf %3, %6 : vector<256x128xf32>
    %c0_6 = arith.constant 0 : index
    %c0_7 = arith.constant 0 : index
    %8 = vector.load %arg7[%c0_6, %c0_7] : memref<256x128xf32, #tpu.memory_space<vmem>>, vector<256x128xf32>
    tpu.vector_store %arg7[%c0_6, %c0_7], %7 {strides = array<i32>} : memref<256x128xf32, #tpu.memory_space<vmem>>, vector<256x128xf32>,
    %c0_i32_8 = arith.constant 0 : i32
    %9 = arith.cmpi eq, %arg1, %c0_i32_8 : i32
    %10 = arith.extui %9 : i1 to i32
    %c0_i32_9 = arith.constant 0 : i32
    %11 = arith.cmpi ne, %10, %c0_i32_9 : i32
    scf.if %11 {
      %c0_10 = arith.constant 0 : index
      %c0_11 = arith.constant 0 : index
      %12 = vector.load %arg7[%c0_10, %c0_11] : memref<256x128xf32, #tpu.memory_space<vmem>>, vector<256x128xf32>
      %c0_12 = arith.constant 0 : index
      %c0_13 = arith.constant 0 : index
      %13 = vector.load %arg4[%c0_12, %c0_13] : memref<256x128xf32, #tpu.memory_space<vmem>>, vector<256x128xf32>
      tpu.vector_store %arg4[%c0_12, %c0_13], %12 {strides = array<i32>} : memref<256x128xf32, #tpu.memory_space<vmem>>, vector<256x128xf32>,
      %cst_14 = arith.constant dense<0.000000e+00> : vector<128xf32>
      %14 = vector.multi_reduction <add>, %12, %cst_14 [0] : vector<256x128xf32> to vector<128xf32>
      %15 = vector.shape_cast %14 : vector<128xf32> to vector<1x128xf32>
      %c0_15 = arith.constant 0 : index
      %c0_16 = arith.constant 0 : index
      %c0_17 = arith.constant 0 : index
      %16 = vector.load %arg5[%c0_15, %c0_16, %c0_17] : memref<1x1x128xf32, #tpu.memory_space<vmem>>, vector<1x1x128xf32>
      %17 = vector.shape_cast %16 : vector<1x1x128xf32> to vector<1x128xf32>
      %18 = vector.shape_cast %15 : vector<1x128xf32> to vector<1x1x128xf32>
      tpu.vector_store %arg5[%c0_15, %c0_16, %c0_17], %18 {strides = array<i32>} : memref<1x1x128xf32, #tpu.memory_space<vmem>>, vector<1x1x128xf32>,
      %19 = arith.mulf %12, %12 : vector<256x128xf32>
      %cst_18 = arith.constant dense<0.000000e+00> : vector<128xf32>
      %20 = vector.multi_reduction <add>, %19, %cst_18 [0] : vector<256x128xf32> to vector<128xf32>
      %21 = vector.shape_cast %20 : vector<128xf32> to vector<1x128xf32>
      %c0_19 = arith.constant 0 : index
      %c0_20 = arith.constant 0 : index
      %c0_21 = arith.constant 0 : index
      %22 = vector.load %arg6[%c0_19, %c0_20, %c0_21] : memref<1x1x128xf32, #tpu.memory_space<vmem>>, vector<1x1x128xf32>
      %23 = vector.shape_cast %22 : vector<1x1x128xf32> to vector<1x128xf32>
      %24 = vector.shape_cast %21 : vector<1x128xf32> to vector<1x1x128xf32>
      tpu.vector_store %arg6[%c0_19, %c0_20, %c0_21], %24 {strides = array<i32>} : memref<1x1x128xf32, #tpu.memory_space<vmem>>, vector<1x1x128xf32>,
    } else {
    }
    return
  }
  func.func @transform_0(%arg0: i32, %arg1: i32) -> (i32, i32) {
    %c0_i32 = arith.constant 0 : i32
    return %arg0, %arg1 : i32, i32
  }
  func.func @transform_1(%arg0: i32, %arg1: i32) -> (i32, i32) {
    %c0_i32 = arith.constant 0 : i32
    %c0_i32_0 = arith.constant 0 : i32
    return %arg1, %c0_i32 : i32, i32
  }
  func.func @transform_2(%arg0: i32, %arg1: i32) -> (i32, i32) {
    %c0_i32 = arith.constant 0 : i32
    %c0_i32_0 = arith.constant 0 : i32
    return %arg0, %c0_i32 : i32, i32
  }
  func.func @transform_3(%arg0: i32, %arg1: i32) -> (i32, i32, i32) {
    %c0_i32 = arith.constant 0 : i32
    %c0_i32_0 = arith.constant 0 : i32
    %c0_i32_1 = arith.constant 0 : i32
    return %arg0, %c0_i32, %c0_i32_0 : i32, i32, i32
  }
  func.func @transform_4(%arg0: i32, %arg1: i32) -> (i32, i32, i32) {
    %c0_i32 = arith.constant 0 : i32
    %c0_i32_0 = arith.constant 0 : i32
    %c0_i32_1 = arith.constant 0 : i32
    return %arg0, %c0_i32, %c0_i32_0 : i32, i32, i32
  }
}

module attributes {stable_mosaic.version = 11 : i64} {
  func.func @_scale_shift_act_kernel(%arg0: i32, %arg1: memref<256x128xf32, #tpu.memory_space<vmem>>, %arg2: memref<1x128xf32, #tpu.memory_space<vmem>>, %arg3: memref<1x128xf32, #tpu.memory_space<vmem>>, %arg4: memref<256x128xbf16, #tpu.memory_space<vmem>>) attributes {dimension_semantics = [#tpu.dimension_semantics<parallel>], iteration_bounds = array<i64: 2>, scalar_prefetch = 0 : i64, scratch_operands = 0 : i64, tpu.core_type = #tpu.core_type<tc>, window_params = [{transform_indices = @transform_0, window_bounds = array<i64: 256, 128>}, {pipeline_mode = #tpu.pipeline_mode<synchronous>, transform_indices = @transform_1, window_bounds = array<i64: 1, 128>}, {pipeline_mode = #tpu.pipeline_mode<synchronous>, transform_indices = @transform_2, window_bounds = array<i64: 1, 128>}, {transform_indices = @transform_3, window_bounds = array<i64: 256, 128>}]} {
    %c0 = arith.constant 0 : index
    %c0_0 = arith.constant 0 : index
    %0 = vector.load %arg1[%c0, %c0_0] : memref<256x128xf32, #tpu.memory_space<vmem>>, vector<256x128xf32>
    %c0_1 = arith.constant 0 : index
    %c0_2 = arith.constant 0 : index
    %1 = vector.load %arg2[%c0_1, %c0_2] : memref<1x128xf32, #tpu.memory_space<vmem>>, vector<1x128xf32>
    %2 = vector.broadcast %1 : vector<1x128xf32> to vector<256x128xf32>
    %3 = arith.mulf %0, %2 : vector<256x128xf32>
    %c0_3 = arith.constant 0 : index
    %c0_4 = arith.constant 0 : index
    %4 = vector.load %arg3[%c0_3, %c0_4] : memref<1x128xf32, #tpu.memory_space<vmem>>, vector<1x128xf32>
    %5 = vector.broadcast %4 : vector<1x128xf32> to vector<256x128xf32>
    %6 = arith.addf %3, %5 : vector<256x128xf32>
    %cst = arith.constant 0.000000e+00 : f32
    %7 = vector.broadcast %cst : f32 to vector<256x128xf32>
    %8 = arith.cmpf oge, %6, %7 : vector<256x128xf32>
    %cst_5 = arith.constant 2.000000e-01 : f32
    %9 = vector.broadcast %cst_5 : f32 to vector<256x128xf32>
    %10 = arith.mulf %9, %6 : vector<256x128xf32>
    %11 = arith.select %8, %6, %10 : vector<256x128xi1>, vector<256x128xf32>
    %12 = arith.truncf %11 : vector<256x128xf32> to vector<256x128xbf16>
    %c0_6 = arith.constant 0 : index
    %c0_7 = arith.constant 0 : index
    %13 = vector.load %arg4[%c0_6, %c0_7] : memref<256x128xbf16, #tpu.memory_space<vmem>>, vector<256x128xbf16>
    tpu.vector_store %arg4[%c0_6, %c0_7], %12 {strides = array<i32>} : memref<256x128xbf16, #tpu.memory_space<vmem>>, vector<256x128xbf16>,
    return
  }
  func.func @transform_0(%arg0: i32) -> (i32, i32) {
    %c0_i32 = arith.constant 0 : i32
    %c0_i32_0 = arith.constant 0 : i32
    return %arg0, %c0_i32 : i32, i32
  }
  func.func @transform_1(%arg0: i32) -> (i32, i32) {
    %c0_i32 = arith.constant 0 : i32
    %c0_i32_0 = arith.constant 0 : i32
    %c0_i32_1 = arith.constant 0 : i32
    return %c0_i32, %c0_i32_0 : i32, i32
  }
  func.func @transform_2(%arg0: i32) -> (i32, i32) {
    %c0_i32 = arith.constant 0 : i32
    %c0_i32_0 = arith.constant 0 : i32
    %c0_i32_1 = arith.constant 0 : i32
    return %c0_i32, %c0_i32_0 : i32, i32
  }
  func.func @transform_3(%arg0: i32) -> (i32, i32) {
    %c0_i32 = arith.constant 0 : i32
    %c0_i32_0 = arith.constant 0 : i32
    return %arg0, %c0_i32 : i32, i32
  }
}

module attributes {stable_mosaic.version = 11 : i64} {
  func.func @_scale_shift_act_kernel(%arg0: i32, %arg1: memref<128x128xf32, #tpu.memory_space<vmem>>, %arg2: memref<1x128xf32, #tpu.memory_space<vmem>>, %arg3: memref<1x128xf32, #tpu.memory_space<vmem>>, %arg4: memref<128x128xbf16, #tpu.memory_space<vmem>>) attributes {dimension_semantics = [#tpu.dimension_semantics<parallel>], iteration_bounds = array<i64: 1>, scalar_prefetch = 0 : i64, scratch_operands = 0 : i64, tpu.core_type = #tpu.core_type<tc>, window_params = [{transform_indices = @transform_0, window_bounds = array<i64: 128, 128>}, {pipeline_mode = #tpu.pipeline_mode<synchronous>, transform_indices = @transform_1, window_bounds = array<i64: 1, 128>}, {pipeline_mode = #tpu.pipeline_mode<synchronous>, transform_indices = @transform_2, window_bounds = array<i64: 1, 128>}, {transform_indices = @transform_3, window_bounds = array<i64: 128, 128>}]} {
    %c0 = arith.constant 0 : index
    %c0_0 = arith.constant 0 : index
    %0 = vector.load %arg1[%c0, %c0_0] : memref<128x128xf32, #tpu.memory_space<vmem>>, vector<128x128xf32>
    %c0_1 = arith.constant 0 : index
    %c0_2 = arith.constant 0 : index
    %1 = vector.load %arg2[%c0_1, %c0_2] : memref<1x128xf32, #tpu.memory_space<vmem>>, vector<1x128xf32>
    %2 = vector.broadcast %1 : vector<1x128xf32> to vector<128x128xf32>
    %3 = arith.mulf %0, %2 : vector<128x128xf32>
    %c0_3 = arith.constant 0 : index
    %c0_4 = arith.constant 0 : index
    %4 = vector.load %arg3[%c0_3, %c0_4] : memref<1x128xf32, #tpu.memory_space<vmem>>, vector<1x128xf32>
    %5 = vector.broadcast %4 : vector<1x128xf32> to vector<128x128xf32>
    %6 = arith.addf %3, %5 : vector<128x128xf32>
    %cst = arith.constant 0.000000e+00 : f32
    %7 = vector.broadcast %cst : f32 to vector<128x128xf32>
    %8 = arith.cmpf oge, %6, %7 : vector<128x128xf32>
    %cst_5 = arith.constant 2.000000e-01 : f32
    %9 = vector.broadcast %cst_5 : f32 to vector<128x128xf32>
    %10 = arith.mulf %9, %6 : vector<128x128xf32>
    %11 = arith.select %8, %6, %10 : vector<128x128xi1>, vector<128x128xf32>
    %12 = arith.truncf %11 : vector<128x128xf32> to vector<128x128xbf16>
    %c0_6 = arith.constant 0 : index
    %c0_7 = arith.constant 0 : index
    %13 = vector.load %arg4[%c0_6, %c0_7] : memref<128x128xbf16, #tpu.memory_space<vmem>>, vector<128x128xbf16>
    tpu.vector_store %arg4[%c0_6, %c0_7], %12 {strides = array<i32>} : memref<128x128xbf16, #tpu.memory_space<vmem>>, vector<128x128xbf16>,
    return
  }
  func.func @transform_0(%arg0: i32) -> (i32, i32) {
    %c0_i32 = arith.constant 0 : i32
    %c0_i32_0 = arith.constant 0 : i32
    return %arg0, %c0_i32 : i32, i32
  }
  func.func @transform_1(%arg0: i32) -> (i32, i32) {
    %c0_i32 = arith.constant 0 : i32
    %c0_i32_0 = arith.constant 0 : i32
    %c0_i32_1 = arith.constant 0 : i32
    return %c0_i32, %c0_i32_0 : i32, i32
  }
  func.func @transform_2(%arg0: i32) -> (i32, i32) {
    %c0_i32 = arith.constant 0 : i32
    %c0_i32_0 = arith.constant 0 : i32
    %c0_i32_1 = arith.constant 0 : i32
    return %c0_i32, %c0_i32_0 : i32, i32
  }
  func.func @transform_3(%arg0: i32) -> (i32, i32) {
    %c0_i32 = arith.constant 0 : i32
    %c0_i32_0 = arith.constant 0 : i32
    return %arg0, %c0_i32 : i32, i32
  }
}

module attributes {stable_mosaic.version = 11 : i64} {
  func.func @_mm_stats_kernel(%arg0: i32, %arg1: i32, %arg2: memref<128x128xbf16, #tpu.memory_space<vmem>>, %arg3: memref<128x128xbf16, #tpu.memory_space<vmem>>, %arg4: memref<128x128xf32, #tpu.memory_space<vmem>>, %arg5: memref<1x1x128xf32, #tpu.memory_space<vmem>>, %arg6: memref<1x1x128xf32, #tpu.memory_space<vmem>>, %arg7: memref<128x128xf32, #tpu.memory_space<vmem>>) attributes {dimension_semantics = [#tpu.dimension_semantics<parallel>, #tpu.dimension_semantics<arbitrary>], iteration_bounds = array<i64: 1, 1>, scalar_prefetch = 0 : i64, scratch_operands = 1 : i64, tpu.core_type = #tpu.core_type<tc>, window_params = [{transform_indices = @transform_0, window_bounds = array<i64: 128, 128>}, {transform_indices = @transform_1, window_bounds = array<i64: 128, 128>}, {transform_indices = @transform_2, window_bounds = array<i64: 128, 128>}, {transform_indices = @transform_3, window_bounds = array<i64: 1, 1, 128>}, {transform_indices = @transform_4, window_bounds = array<i64: 1, 1, 128>}]} {
    %c0_i32 = arith.constant 0 : i32
    %0 = arith.cmpi eq, %arg1, %c0_i32 : i32
    %1 = arith.extui %0 : i1 to i32
    %c0_i32_0 = arith.constant 0 : i32
    %2 = arith.cmpi ne, %1, %c0_i32_0 : i32
    scf.if %2 {
      %cst_10 = arith.constant 0.000000e+00 : f32
      %12 = vector.broadcast %cst_10 : f32 to vector<128x128xf32>
      %c0_11 = arith.constant 0 : index
      %c0_12 = arith.constant 0 : index
      %13 = vector.load %arg7[%c0_11, %c0_12] : memref<128x128xf32, #tpu.memory_space<vmem>>, vector<128x128xf32>
      tpu.vector_store %arg7[%c0_11, %c0_12], %12 {strides = array<i32>} : memref<128x128xf32, #tpu.memory_space<vmem>>, vector<128x128xf32>,
    } else {
    }
    %c0 = arith.constant 0 : index
    %c0_1 = arith.constant 0 : index
    %3 = vector.load %arg7[%c0, %c0_1] : memref<128x128xf32, #tpu.memory_space<vmem>>, vector<128x128xf32>
    %c0_2 = arith.constant 0 : index
    %c0_3 = arith.constant 0 : index
    %4 = vector.load %arg2[%c0_2, %c0_3] : memref<128x128xbf16, #tpu.memory_space<vmem>>, vector<128x128xbf16>
    %c0_4 = arith.constant 0 : index
    %c0_5 = arith.constant 0 : index
    %5 = vector.load %arg3[%c0_4, %c0_5] : memref<128x128xbf16, #tpu.memory_space<vmem>>, vector<128x128xbf16>
    %cst = arith.constant dense<0.000000e+00> : vector<128x128xf32>
    %6 = tpu.matmul %4, %5, %cst {dimension_numbers = #tpu.dot_dimension_numbers<[1], [0], [0], [1], [0, 0, 1, 1], [], []>} : vector<128x128xbf16>, vector<128x128xbf16>, vector<128x128xf32> -> vector<128x128xf32>
    %7 = arith.addf %3, %6 : vector<128x128xf32>
    %c0_6 = arith.constant 0 : index
    %c0_7 = arith.constant 0 : index
    %8 = vector.load %arg7[%c0_6, %c0_7] : memref<128x128xf32, #tpu.memory_space<vmem>>, vector<128x128xf32>
    tpu.vector_store %arg7[%c0_6, %c0_7], %7 {strides = array<i32>} : memref<128x128xf32, #tpu.memory_space<vmem>>, vector<128x128xf32>,
    %c0_i32_8 = arith.constant 0 : i32
    %9 = arith.cmpi eq, %arg1, %c0_i32_8 : i32
    %10 = arith.extui %9 : i1 to i32
    %c0_i32_9 = arith.constant 0 : i32
    %11 = arith.cmpi ne, %10, %c0_i32_9 : i32
    scf.if %11 {
      %c0_10 = arith.constant 0 : index
      %c0_11 = arith.constant 0 : index
      %12 = vector.load %arg7[%c0_10, %c0_11] : memref<128x128xf32, #tpu.memory_space<vmem>>, vector<128x128xf32>
      %c0_12 = arith.constant 0 : index
      %c0_13 = arith.constant 0 : index
      %13 = vector.load %arg4[%c0_12, %c0_13] : memref<128x128xf32, #tpu.memory_space<vmem>>, vector<128x128xf32>
      tpu.vector_store %arg4[%c0_12, %c0_13], %12 {strides = array<i32>} : memref<128x128xf32, #tpu.memory_space<vmem>>, vector<128x128xf32>,
      %cst_14 = arith.constant dense<0.000000e+00> : vector<128xf32>
      %14 = vector.multi_reduction <add>, %12, %cst_14 [0] : vector<128x128xf32> to vector<128xf32>
      %15 = vector.shape_cast %14 : vector<128xf32> to vector<1x128xf32>
      %c0_15 = arith.constant 0 : index
      %c0_16 = arith.constant 0 : index
      %c0_17 = arith.constant 0 : index
      %16 = vector.load %arg5[%c0_15, %c0_16, %c0_17] : memref<1x1x128xf32, #tpu.memory_space<vmem>>, vector<1x1x128xf32>
      %17 = vector.shape_cast %16 : vector<1x1x128xf32> to vector<1x128xf32>
      %18 = vector.shape_cast %15 : vector<1x128xf32> to vector<1x1x128xf32>
      tpu.vector_store %arg5[%c0_15, %c0_16, %c0_17], %18 {strides = array<i32>} : memref<1x1x128xf32, #tpu.memory_space<vmem>>, vector<1x1x128xf32>,
      %19 = arith.mulf %12, %12 : vector<128x128xf32>
      %cst_18 = arith.constant dense<0.000000e+00> : vector<128xf32>
      %20 = vector.multi_reduction <add>, %19, %cst_18 [0] : vector<128x128xf32> to vector<128xf32>
      %21 = vector.shape_cast %20 : vector<128xf32> to vector<1x128xf32>
      %c0_19 = arith.constant 0 : index
      %c0_20 = arith.constant 0 : index
      %c0_21 = arith.constant 0 : index
      %22 = vector.load %arg6[%c0_19, %c0_20, %c0_21] : memref<1x1x128xf32, #tpu.memory_space<vmem>>, vector<1x1x128xf32>
      %23 = vector.shape_cast %22 : vector<1x1x128xf32> to vector<1x128xf32>
      %24 = vector.shape_cast %21 : vector<1x128xf32> to vector<1x1x128xf32>
      tpu.vector_store %arg6[%c0_19, %c0_20, %c0_21], %24 {strides = array<i32>} : memref<1x1x128xf32, #tpu.memory_space<vmem>>, vector<1x1x128xf32>,
    } else {
    }
    return
  }
  func.func @transform_0(%arg0: i32, %arg1: i32) -> (i32, i32) {
    %c0_i32 = arith.constant 0 : i32
    return %arg0, %arg1 : i32, i32
  }
  func.func @transform_1(%arg0: i32, %arg1: i32) -> (i32, i32) {
    %c0_i32 = arith.constant 0 : i32
    %c0_i32_0 = arith.constant 0 : i32
    return %arg1, %c0_i32 : i32, i32
  }
  func.func @transform_2(%arg0: i32, %arg1: i32) -> (i32, i32) {
    %c0_i32 = arith.constant 0 : i32
    %c0_i32_0 = arith.constant 0 : i32
    return %arg0, %c0_i32 : i32, i32
  }
  func.func @transform_3(%arg0: i32, %arg1: i32) -> (i32, i32, i32) {
    %c0_i32 = arith.constant 0 : i32
    %c0_i32_0 = arith.constant 0 : i32
    %c0_i32_1 = arith.constant 0 : i32
    return %arg0, %c0_i32, %c0_i32_0 : i32, i32, i32
  }
  func.func @transform_4(%arg0: i32, %arg1: i32) -> (i32, i32, i32) {
    %c0_i32 = arith.constant 0 : i32
    %c0_i32_0 = arith.constant 0 : i32
    %c0_i32_1 = arith.constant 0 : i32
    return %arg0, %c0_i32, %c0_i32_0 : i32, i32, i32
  }
}

module attributes {stable_mosaic.version = 11 : i64} {
  func.func @_mm_stats_kernel(%arg0: i32, %arg1: i32, %arg2: memref<32x256xbf16, #tpu.memory_space<vmem>>, %arg3: memref<256x128xbf16, #tpu.memory_space<vmem>>, %arg4: memref<32x128xf32, #tpu.memory_space<vmem>>, %arg5: memref<1x1x128xf32, #tpu.memory_space<vmem>>, %arg6: memref<1x1x128xf32, #tpu.memory_space<vmem>>, %arg7: memref<32x128xf32, #tpu.memory_space<vmem>>) attributes {dimension_semantics = [#tpu.dimension_semantics<parallel>, #tpu.dimension_semantics<arbitrary>], iteration_bounds = array<i64: 1, 1>, scalar_prefetch = 0 : i64, scratch_operands = 1 : i64, tpu.core_type = #tpu.core_type<tc>, window_params = [{transform_indices = @transform_0, window_bounds = array<i64: 32, 256>}, {transform_indices = @transform_1, window_bounds = array<i64: 256, 128>}, {transform_indices = @transform_2, window_bounds = array<i64: 32, 128>}, {transform_indices = @transform_3, window_bounds = array<i64: 1, 1, 128>}, {transform_indices = @transform_4, window_bounds = array<i64: 1, 1, 128>}]} {
    %c0_i32 = arith.constant 0 : i32
    %0 = arith.cmpi eq, %arg1, %c0_i32 : i32
    %1 = arith.extui %0 : i1 to i32
    %c0_i32_0 = arith.constant 0 : i32
    %2 = arith.cmpi ne, %1, %c0_i32_0 : i32
    scf.if %2 {
      %cst_10 = arith.constant 0.000000e+00 : f32
      %12 = vector.broadcast %cst_10 : f32 to vector<32x128xf32>
      %c0_11 = arith.constant 0 : index
      %c0_12 = arith.constant 0 : index
      %13 = vector.load %arg7[%c0_11, %c0_12] : memref<32x128xf32, #tpu.memory_space<vmem>>, vector<32x128xf32>
      tpu.vector_store %arg7[%c0_11, %c0_12], %12 {strides = array<i32>} : memref<32x128xf32, #tpu.memory_space<vmem>>, vector<32x128xf32>,
    } else {
    }
    %c0 = arith.constant 0 : index
    %c0_1 = arith.constant 0 : index
    %3 = vector.load %arg7[%c0, %c0_1] : memref<32x128xf32, #tpu.memory_space<vmem>>, vector<32x128xf32>
    %c0_2 = arith.constant 0 : index
    %c0_3 = arith.constant 0 : index
    %4 = vector.load %arg2[%c0_2, %c0_3] : memref<32x256xbf16, #tpu.memory_space<vmem>>, vector<32x256xbf16>
    %c0_4 = arith.constant 0 : index
    %c0_5 = arith.constant 0 : index
    %5 = vector.load %arg3[%c0_4, %c0_5] : memref<256x128xbf16, #tpu.memory_space<vmem>>, vector<256x128xbf16>
    %cst = arith.constant dense<0.000000e+00> : vector<32x128xf32>
    %6 = tpu.matmul %4, %5, %cst {dimension_numbers = #tpu.dot_dimension_numbers<[1], [0], [0], [1], [0, 0, 1, 1], [], []>} : vector<32x256xbf16>, vector<256x128xbf16>, vector<32x128xf32> -> vector<32x128xf32>
    %7 = arith.addf %3, %6 : vector<32x128xf32>
    %c0_6 = arith.constant 0 : index
    %c0_7 = arith.constant 0 : index
    %8 = vector.load %arg7[%c0_6, %c0_7] : memref<32x128xf32, #tpu.memory_space<vmem>>, vector<32x128xf32>
    tpu.vector_store %arg7[%c0_6, %c0_7], %7 {strides = array<i32>} : memref<32x128xf32, #tpu.memory_space<vmem>>, vector<32x128xf32>,
    %c0_i32_8 = arith.constant 0 : i32
    %9 = arith.cmpi eq, %arg1, %c0_i32_8 : i32
    %10 = arith.extui %9 : i1 to i32
    %c0_i32_9 = arith.constant 0 : i32
    %11 = arith.cmpi ne, %10, %c0_i32_9 : i32
    scf.if %11 {
      %c0_10 = arith.constant 0 : index
      %c0_11 = arith.constant 0 : index
      %12 = vector.load %arg7[%c0_10, %c0_11] : memref<32x128xf32, #tpu.memory_space<vmem>>, vector<32x128xf32>
      %c0_12 = arith.constant 0 : index
      %c0_13 = arith.constant 0 : index
      %13 = vector.load %arg4[%c0_12, %c0_13] : memref<32x128xf32, #tpu.memory_space<vmem>>, vector<32x128xf32>
      tpu.vector_store %arg4[%c0_12, %c0_13], %12 {strides = array<i32>} : memref<32x128xf32, #tpu.memory_space<vmem>>, vector<32x128xf32>,
      %cst_14 = arith.constant dense<0.000000e+00> : vector<128xf32>
      %14 = vector.multi_reduction <add>, %12, %cst_14 [0] : vector<32x128xf32> to vector<128xf32>
      %15 = vector.shape_cast %14 : vector<128xf32> to vector<1x128xf32>
      %c0_15 = arith.constant 0 : index
      %c0_16 = arith.constant 0 : index
      %c0_17 = arith.constant 0 : index
      %16 = vector.load %arg5[%c0_15, %c0_16, %c0_17] : memref<1x1x128xf32, #tpu.memory_space<vmem>>, vector<1x1x128xf32>
      %17 = vector.shape_cast %16 : vector<1x1x128xf32> to vector<1x128xf32>
      %18 = vector.shape_cast %15 : vector<1x128xf32> to vector<1x1x128xf32>
      tpu.vector_store %arg5[%c0_15, %c0_16, %c0_17], %18 {strides = array<i32>} : memref<1x1x128xf32, #tpu.memory_space<vmem>>, vector<1x1x128xf32>,
      %19 = arith.mulf %12, %12 : vector<32x128xf32>
      %cst_18 = arith.constant dense<0.000000e+00> : vector<128xf32>
      %20 = vector.multi_reduction <add>, %19, %cst_18 [0] : vector<32x128xf32> to vector<128xf32>
      %21 = vector.shape_cast %20 : vector<128xf32> to vector<1x128xf32>
      %c0_19 = arith.constant 0 : index
      %c0_20 = arith.constant 0 : index
      %c0_21 = arith.constant 0 : index
      %22 = vector.load %arg6[%c0_19, %c0_20, %c0_21] : memref<1x1x128xf32, #tpu.memory_space<vmem>>, vector<1x1x128xf32>
      %23 = vector.shape_cast %22 : vector<1x1x128xf32> to vector<1x128xf32>
      %24 = vector.shape_cast %21 : vector<1x128xf32> to vector<1x1x128xf32>
      tpu.vector_store %arg6[%c0_19, %c0_20, %c0_21], %24 {strides = array<i32>} : memref<1x1x128xf32, #tpu.memory_space<vmem>>, vector<1x1x128xf32>,
    } else {
    }
    return
  }
  func.func @transform_0(%arg0: i32, %arg1: i32) -> (i32, i32) {
    %c0_i32 = arith.constant 0 : i32
    return %arg0, %arg1 : i32, i32
  }
  func.func @transform_1(%arg0: i32, %arg1: i32) -> (i32, i32) {
    %c0_i32 = arith.constant 0 : i32
    %c0_i32_0 = arith.constant 0 : i32
    return %arg1, %c0_i32 : i32, i32
  }
  func.func @transform_2(%arg0: i32, %arg1: i32) -> (i32, i32) {
    %c0_i32 = arith.constant 0 : i32
    %c0_i32_0 = arith.constant 0 : i32
    return %arg0, %c0_i32 : i32, i32
  }
  func.func @transform_3(%arg0: i32, %arg1: i32) -> (i32, i32, i32) {
    %c0_i32 = arith.constant 0 : i32
    %c0_i32_0 = arith.constant 0 : i32
    %c0_i32_1 = arith.constant 0 : i32
    return %arg0, %c0_i32, %c0_i32_0 : i32, i32, i32
  }
  func.func @transform_4(%arg0: i32, %arg1: i32) -> (i32, i32, i32) {
    %c0_i32 = arith.constant 0 : i32
    %c0_i32_0 = arith.constant 0 : i32
    %c0_i32_1 = arith.constant 0 : i32
    return %arg0, %c0_i32, %c0_i32_0 : i32, i32, i32
  }
}

module attributes {stable_mosaic.version = 11 : i64} {
  func.func @_scale_shift_act_kernel(%arg0: i32, %arg1: memref<32x128xf32, #tpu.memory_space<vmem>>, %arg2: memref<1x128xf32, #tpu.memory_space<vmem>>, %arg3: memref<1x128xf32, #tpu.memory_space<vmem>>, %arg4: memref<32x128xbf16, #tpu.memory_space<vmem>>) attributes {dimension_semantics = [#tpu.dimension_semantics<parallel>], iteration_bounds = array<i64: 1>, scalar_prefetch = 0 : i64, scratch_operands = 0 : i64, tpu.core_type = #tpu.core_type<tc>, window_params = [{transform_indices = @transform_0, window_bounds = array<i64: 32, 128>}, {pipeline_mode = #tpu.pipeline_mode<synchronous>, transform_indices = @transform_1, window_bounds = array<i64: 1, 128>}, {pipeline_mode = #tpu.pipeline_mode<synchronous>, transform_indices = @transform_2, window_bounds = array<i64: 1, 128>}, {transform_indices = @transform_3, window_bounds = array<i64: 32, 128>}]} {
    %c0 = arith.constant 0 : index
    %c0_0 = arith.constant 0 : index
    %0 = vector.load %arg1[%c0, %c0_0] : memref<32x128xf32, #tpu.memory_space<vmem>>, vector<32x128xf32>
    %c0_1 = arith.constant 0 : index
    %c0_2 = arith.constant 0 : index
    %1 = vector.load %arg2[%c0_1, %c0_2] : memref<1x128xf32, #tpu.memory_space<vmem>>, vector<1x128xf32>
    %2 = vector.broadcast %1 : vector<1x128xf32> to vector<32x128xf32>
    %3 = arith.mulf %0, %2 : vector<32x128xf32>
    %c0_3 = arith.constant 0 : index
    %c0_4 = arith.constant 0 : index
    %4 = vector.load %arg3[%c0_3, %c0_4] : memref<1x128xf32, #tpu.memory_space<vmem>>, vector<1x128xf32>
    %5 = vector.broadcast %4 : vector<1x128xf32> to vector<32x128xf32>
    %6 = arith.addf %3, %5 : vector<32x128xf32>
    %cst = arith.constant 0.000000e+00 : f32
    %7 = vector.broadcast %cst : f32 to vector<32x128xf32>
    %8 = arith.cmpf oge, %6, %7 : vector<32x128xf32>
    %cst_5 = arith.constant 2.000000e-01 : f32
    %9 = vector.broadcast %cst_5 : f32 to vector<32x128xf32>
    %10 = arith.mulf %9, %6 : vector<32x128xf32>
    %11 = arith.select %8, %6, %10 : vector<32x128xi1>, vector<32x128xf32>
    %12 = arith.truncf %11 : vector<32x128xf32> to vector<32x128xbf16>
    %c0_6 = arith.constant 0 : index
    %c0_7 = arith.constant 0 : index
    %13 = vector.load %arg4[%c0_6, %c0_7] : memref<32x128xbf16, #tpu.memory_space<vmem>>, vector<32x128xbf16>
    tpu.vector_store %arg4[%c0_6, %c0_7], %12 {strides = array<i32>} : memref<32x128xbf16, #tpu.memory_space<vmem>>, vector<32x128xbf16>,
    return
  }
  func.func @transform_0(%arg0: i32) -> (i32, i32) {
    %c0_i32 = arith.constant 0 : i32
    %c0_i32_0 = arith.constant 0 : i32
    return %arg0, %c0_i32 : i32, i32
  }
  func.func @transform_1(%arg0: i32) -> (i32, i32) {
    %c0_i32 = arith.constant 0 : i32
    %c0_i32_0 = arith.constant 0 : i32
    %c0_i32_1 = arith.constant 0 : i32
    return %c0_i32, %c0_i32_0 : i32, i32
  }
  func.func @transform_2(%arg0: i32) -> (i32, i32) {
    %c0_i32 = arith.constant 0 : i32
    %c0_i32_0 = arith.constant 0 : i32
    %c0_i32_1 = arith.constant 0 : i32
    return %c0_i32, %c0_i32_0 : i32, i32
  }
  func.func @transform_3(%arg0: i32) -> (i32, i32) {
    %c0_i32 = arith.constant 0 : i32
    %c0_i32_0 = arith.constant 0 : i32
    return %arg0, %c0_i32 : i32, i32
  }
}

module attributes {stable_mosaic.version = 11 : i64} {
  func.func @_mm_stats_kernel(%arg0: i32, %arg1: i32, %arg2: memref<8x512xbf16, #tpu.memory_space<vmem>>, %arg3: memref<512x128xbf16, #tpu.memory_space<vmem>>, %arg4: memref<8x128xf32, #tpu.memory_space<vmem>>, %arg5: memref<1x1x128xf32, #tpu.memory_space<vmem>>, %arg6: memref<1x1x128xf32, #tpu.memory_space<vmem>>, %arg7: memref<8x128xf32, #tpu.memory_space<vmem>>) attributes {dimension_semantics = [#tpu.dimension_semantics<parallel>, #tpu.dimension_semantics<arbitrary>], iteration_bounds = array<i64: 1, 1>, scalar_prefetch = 0 : i64, scratch_operands = 1 : i64, tpu.core_type = #tpu.core_type<tc>, window_params = [{transform_indices = @transform_0, window_bounds = array<i64: 8, 512>}, {transform_indices = @transform_1, window_bounds = array<i64: 512, 128>}, {transform_indices = @transform_2, window_bounds = array<i64: 8, 128>}, {transform_indices = @transform_3, window_bounds = array<i64: 1, 1, 128>}, {transform_indices = @transform_4, window_bounds = array<i64: 1, 1, 128>}]} {
    %c0_i32 = arith.constant 0 : i32
    %0 = arith.cmpi eq, %arg1, %c0_i32 : i32
    %1 = arith.extui %0 : i1 to i32
    %c0_i32_0 = arith.constant 0 : i32
    %2 = arith.cmpi ne, %1, %c0_i32_0 : i32
    scf.if %2 {
      %cst_10 = arith.constant 0.000000e+00 : f32
      %12 = vector.broadcast %cst_10 : f32 to vector<8x128xf32>
      %c0_11 = arith.constant 0 : index
      %c0_12 = arith.constant 0 : index
      %13 = vector.load %arg7[%c0_11, %c0_12] : memref<8x128xf32, #tpu.memory_space<vmem>>, vector<8x128xf32>
      tpu.vector_store %arg7[%c0_11, %c0_12], %12 {strides = array<i32>} : memref<8x128xf32, #tpu.memory_space<vmem>>, vector<8x128xf32>,
    } else {
    }
    %c0 = arith.constant 0 : index
    %c0_1 = arith.constant 0 : index
    %3 = vector.load %arg7[%c0, %c0_1] : memref<8x128xf32, #tpu.memory_space<vmem>>, vector<8x128xf32>
    %c0_2 = arith.constant 0 : index
    %c0_3 = arith.constant 0 : index
    %4 = vector.load %arg2[%c0_2, %c0_3] : memref<8x512xbf16, #tpu.memory_space<vmem>>, vector<8x512xbf16>
    %c0_4 = arith.constant 0 : index
    %c0_5 = arith.constant 0 : index
    %5 = vector.load %arg3[%c0_4, %c0_5] : memref<512x128xbf16, #tpu.memory_space<vmem>>, vector<512x128xbf16>
    %cst = arith.constant dense<0.000000e+00> : vector<8x128xf32>
    %6 = tpu.matmul %4, %5, %cst {dimension_numbers = #tpu.dot_dimension_numbers<[1], [0], [0], [1], [0, 0, 1, 1], [], []>} : vector<8x512xbf16>, vector<512x128xbf16>, vector<8x128xf32> -> vector<8x128xf32>
    %7 = arith.addf %3, %6 : vector<8x128xf32>
    %c0_6 = arith.constant 0 : index
    %c0_7 = arith.constant 0 : index
    %8 = vector.load %arg7[%c0_6, %c0_7] : memref<8x128xf32, #tpu.memory_space<vmem>>, vector<8x128xf32>
    tpu.vector_store %arg7[%c0_6, %c0_7], %7 {strides = array<i32>} : memref<8x128xf32, #tpu.memory_space<vmem>>, vector<8x128xf32>,
    %c0_i32_8 = arith.constant 0 : i32
    %9 = arith.cmpi eq, %arg1, %c0_i32_8 : i32
    %10 = arith.extui %9 : i1 to i32
    %c0_i32_9 = arith.constant 0 : i32
    %11 = arith.cmpi ne, %10, %c0_i32_9 : i32
    scf.if %11 {
      %c0_10 = arith.constant 0 : index
      %c0_11 = arith.constant 0 : index
      %12 = vector.load %arg7[%c0_10, %c0_11] : memref<8x128xf32, #tpu.memory_space<vmem>>, vector<8x128xf32>
      %c0_12 = arith.constant 0 : index
      %c0_13 = arith.constant 0 : index
      %13 = vector.load %arg4[%c0_12, %c0_13] : memref<8x128xf32, #tpu.memory_space<vmem>>, vector<8x128xf32>
      tpu.vector_store %arg4[%c0_12, %c0_13], %12 {strides = array<i32>} : memref<8x128xf32, #tpu.memory_space<vmem>>, vector<8x128xf32>,
      %cst_14 = arith.constant dense<0.000000e+00> : vector<128xf32>
      %14 = vector.multi_reduction <add>, %12, %cst_14 [0] : vector<8x128xf32> to vector<128xf32>
      %15 = vector.shape_cast %14 : vector<128xf32> to vector<1x128xf32>
      %c0_15 = arith.constant 0 : index
      %c0_16 = arith.constant 0 : index
      %c0_17 = arith.constant 0 : index
      %16 = vector.load %arg5[%c0_15, %c0_16, %c0_17] : memref<1x1x128xf32, #tpu.memory_space<vmem>>, vector<1x1x128xf32>
      %17 = vector.shape_cast %16 : vector<1x1x128xf32> to vector<1x128xf32>
      %18 = vector.shape_cast %15 : vector<1x128xf32> to vector<1x1x128xf32>
      tpu.vector_store %arg5[%c0_15, %c0_16, %c0_17], %18 {strides = array<i32>} : memref<1x1x128xf32, #tpu.memory_space<vmem>>, vector<1x1x128xf32>,
      %19 = arith.mulf %12, %12 : vector<8x128xf32>
      %cst_18 = arith.constant dense<0.000000e+00> : vector<128xf32>
      %20 = vector.multi_reduction <add>, %19, %cst_18 [0] : vector<8x128xf32> to vector<128xf32>
      %21 = vector.shape_cast %20 : vector<128xf32> to vector<1x128xf32>
      %c0_19 = arith.constant 0 : index
      %c0_20 = arith.constant 0 : index
      %c0_21 = arith.constant 0 : index
      %22 = vector.load %arg6[%c0_19, %c0_20, %c0_21] : memref<1x1x128xf32, #tpu.memory_space<vmem>>, vector<1x1x128xf32>
      %23 = vector.shape_cast %22 : vector<1x1x128xf32> to vector<1x128xf32>
      %24 = vector.shape_cast %21 : vector<1x128xf32> to vector<1x1x128xf32>
      tpu.vector_store %arg6[%c0_19, %c0_20, %c0_21], %24 {strides = array<i32>} : memref<1x1x128xf32, #tpu.memory_space<vmem>>, vector<1x1x128xf32>,
    } else {
    }
    return
  }
  func.func @transform_0(%arg0: i32, %arg1: i32) -> (i32, i32) {
    %c0_i32 = arith.constant 0 : i32
    return %arg0, %arg1 : i32, i32
  }
  func.func @transform_1(%arg0: i32, %arg1: i32) -> (i32, i32) {
    %c0_i32 = arith.constant 0 : i32
    %c0_i32_0 = arith.constant 0 : i32
    return %arg1, %c0_i32 : i32, i32
  }
  func.func @transform_2(%arg0: i32, %arg1: i32) -> (i32, i32) {
    %c0_i32 = arith.constant 0 : i32
    %c0_i32_0 = arith.constant 0 : i32
    return %arg0, %c0_i32 : i32, i32
  }
  func.func @transform_3(%arg0: i32, %arg1: i32) -> (i32, i32, i32) {
    %c0_i32 = arith.constant 0 : i32
    %c0_i32_0 = arith.constant 0 : i32
    %c0_i32_1 = arith.constant 0 : i32
    return %arg0, %c0_i32, %c0_i32_0 : i32, i32, i32
  }
  func.func @transform_4(%arg0: i32, %arg1: i32) -> (i32, i32, i32) {
    %c0_i32 = arith.constant 0 : i32
    %c0_i32_0 = arith.constant 0 : i32
    %c0_i32_1 = arith.constant 0 : i32
    return %arg0, %c0_i32, %c0_i32_0 : i32, i32, i32
  }
}

module attributes {stable_mosaic.version = 11 : i64} {
  func.func @_scale_shift_act_kernel(%arg0: i32, %arg1: memref<8x128xf32, #tpu.memory_space<vmem>>, %arg2: memref<1x128xf32, #tpu.memory_space<vmem>>, %arg3: memref<1x128xf32, #tpu.memory_space<vmem>>, %arg4: memref<8x128xbf16, #tpu.memory_space<vmem>>) attributes {dimension_semantics = [#tpu.dimension_semantics<parallel>], iteration_bounds = array<i64: 1>, scalar_prefetch = 0 : i64, scratch_operands = 0 : i64, tpu.core_type = #tpu.core_type<tc>, window_params = [{transform_indices = @transform_0, window_bounds = array<i64: 8, 128>}, {pipeline_mode = #tpu.pipeline_mode<synchronous>, transform_indices = @transform_1, window_bounds = array<i64: 1, 128>}, {pipeline_mode = #tpu.pipeline_mode<synchronous>, transform_indices = @transform_2, window_bounds = array<i64: 1, 128>}, {transform_indices = @transform_3, window_bounds = array<i64: 8, 128>}]} {
    %c0 = arith.constant 0 : index
    %c0_0 = arith.constant 0 : index
    %0 = vector.load %arg1[%c0, %c0_0] : memref<8x128xf32, #tpu.memory_space<vmem>>, vector<8x128xf32>
    %c0_1 = arith.constant 0 : index
    %c0_2 = arith.constant 0 : index
    %1 = vector.load %arg2[%c0_1, %c0_2] : memref<1x128xf32, #tpu.memory_space<vmem>>, vector<1x128xf32>
    %2 = vector.broadcast %1 : vector<1x128xf32> to vector<8x128xf32>
    %3 = arith.mulf %0, %2 : vector<8x128xf32>
    %c0_3 = arith.constant 0 : index
    %c0_4 = arith.constant 0 : index
    %4 = vector.load %arg3[%c0_3, %c0_4] : memref<1x128xf32, #tpu.memory_space<vmem>>, vector<1x128xf32>
    %5 = vector.broadcast %4 : vector<1x128xf32> to vector<8x128xf32>
    %6 = arith.addf %3, %5 : vector<8x128xf32>
    %7 = arith.truncf %6 : vector<8x128xf32> to vector<8x128xbf16>
    %c0_5 = arith.constant 0 : index
    %c0_6 = arith.constant 0 : index
    %8 = vector.load %arg4[%c0_5, %c0_6] : memref<8x128xbf16, #tpu.memory_space<vmem>>, vector<8x128xbf16>
    tpu.vector_store %arg4[%c0_5, %c0_6], %7 {strides = array<i32>} : memref<8x128xbf16, #tpu.memory_space<vmem>>, vector<8x128xbf16>,
    return
  }
  func.func @transform_0(%arg0: i32) -> (i32, i32) {
    %c0_i32 = arith.constant 0 : i32
    %c0_i32_0 = arith.constant 0 : i32
    return %arg0, %c0_i32 : i32, i32
  }
  func.func @transform_1(%arg0: i32) -> (i32, i32) {
    %c0_i32 = arith.constant 0 : i32
    %c0_i32_0 = arith.constant 0 : i32
    %c0_i32_1 = arith.constant 0 : i32
    return %c0_i32, %c0_i32_0 : i32, i32
  }
  func.func @transform_2(%arg0: i32) -> (i32, i32) {
    %c0_i32 = arith.constant 0 : i32
    %c0_i32_0 = arith.constant 0 : i32
    %c0_i32_1 = arith.constant 0 : i32
    return %c0_i32, %c0_i32_0 : i32, i32
  }
  func.func @transform_3(%arg0: i32) -> (i32, i32) {
    %c0_i32 = arith.constant 0 : i32
    %c0_i32_0 = arith.constant 0 : i32
    return %arg0, %c0_i32 : i32, i32
  }
}

module attributes {stable_mosaic.version = 11 : i64} {
  func.func @_mm_bias_kernel(%arg0: i32, %arg1: i32, %arg2: memref<8x512xbf16, #tpu.memory_space<vmem>>, %arg3: memref<512x128xbf16, #tpu.memory_space<vmem>>, %arg4: memref<1x128xf32, #tpu.memory_space<vmem>>, %arg5: memref<8x128xf32, #tpu.memory_space<vmem>>, %arg6: memref<8x128xf32, #tpu.memory_space<vmem>>) attributes {dimension_semantics = [#tpu.dimension_semantics<parallel>, #tpu.dimension_semantics<arbitrary>], iteration_bounds = array<i64: 1, 2>, scalar_prefetch = 0 : i64, scratch_operands = 1 : i64, tpu.core_type = #tpu.core_type<tc>, window_params = [{transform_indices = @transform_0, window_bounds = array<i64: 8, 512>}, {transform_indices = @transform_1, window_bounds = array<i64: 512, 128>}, {pipeline_mode = #tpu.pipeline_mode<synchronous>, transform_indices = @transform_2, window_bounds = array<i64: 1, 128>}, {transform_indices = @transform_3, window_bounds = array<i64: 8, 128>}]} {
    %c0_i32 = arith.constant 0 : i32
    %0 = arith.cmpi eq, %arg1, %c0_i32 : i32
    %1 = arith.extui %0 : i1 to i32
    %c0_i32_0 = arith.constant 0 : i32
    %2 = arith.cmpi ne, %1, %c0_i32_0 : i32
    scf.if %2 {
      %cst_9 = arith.constant 0.000000e+00 : f32
      %12 = vector.broadcast %cst_9 : f32 to vector<8x128xf32>
      %c0_10 = arith.constant 0 : index
      %c0_11 = arith.constant 0 : index
      %13 = vector.load %arg6[%c0_10, %c0_11] : memref<8x128xf32, #tpu.memory_space<vmem>>, vector<8x128xf32>
      tpu.vector_store %arg6[%c0_10, %c0_11], %12 {strides = array<i32>} : memref<8x128xf32, #tpu.memory_space<vmem>>, vector<8x128xf32>,
    } else {
    }
    %c0 = arith.constant 0 : index
    %c0_1 = arith.constant 0 : index
    %3 = vector.load %arg6[%c0, %c0_1] : memref<8x128xf32, #tpu.memory_space<vmem>>, vector<8x128xf32>
    %c0_2 = arith.constant 0 : index
    %c0_3 = arith.constant 0 : index
    %4 = vector.load %arg2[%c0_2, %c0_3] : memref<8x512xbf16, #tpu.memory_space<vmem>>, vector<8x512xbf16>
    %c0_4 = arith.constant 0 : index
    %c0_5 = arith.constant 0 : index
    %5 = vector.load %arg3[%c0_4, %c0_5] : memref<512x128xbf16, #tpu.memory_space<vmem>>, vector<512x128xbf16>
    %cst = arith.constant dense<0.000000e+00> : vector<8x128xf32>
    %6 = tpu.matmul %4, %5, %cst {dimension_numbers = #tpu.dot_dimension_numbers<[1], [0], [0], [1], [0, 0, 1, 1], [], []>} : vector<8x512xbf16>, vector<512x128xbf16>, vector<8x128xf32> -> vector<8x128xf32>
    %7 = arith.addf %3, %6 : vector<8x128xf32>
    %c0_6 = arith.constant 0 : index
    %c0_7 = arith.constant 0 : index
    %8 = vector.load %arg6[%c0_6, %c0_7] : memref<8x128xf32, #tpu.memory_space<vmem>>, vector<8x128xf32>
    tpu.vector_store %arg6[%c0_6, %c0_7], %7 {strides = array<i32>} : memref<8x128xf32, #tpu.memory_space<vmem>>, vector<8x128xf32>,
    %c1_i32 = arith.constant 1 : i32
    %9 = arith.cmpi eq, %arg1, %c1_i32 : i32
    %10 = arith.extui %9 : i1 to i32
    %c0_i32_8 = arith.constant 0 : i32
    %11 = arith.cmpi ne, %10, %c0_i32_8 : i32
    scf.if %11 {
      %c0_9 = arith.constant 0 : index
      %c0_10 = arith.constant 0 : index
      %12 = vector.load %arg6[%c0_9, %c0_10] : memref<8x128xf32, #tpu.memory_space<vmem>>, vector<8x128xf32>
      %c0_11 = arith.constant 0 : index
      %c0_12 = arith.constant 0 : index
      %13 = vector.load %arg4[%c0_11, %c0_12] : memref<1x128xf32, #tpu.memory_space<vmem>>, vector<1x128xf32>
      %14 = vector.broadcast %13 : vector<1x128xf32> to vector<8x128xf32>
      %15 = arith.addf %12, %14 : vector<8x128xf32>
      %c0_13 = arith.constant 0 : index
      %c0_14 = arith.constant 0 : index
      %16 = vector.load %arg5[%c0_13, %c0_14] : memref<8x128xf32, #tpu.memory_space<vmem>>, vector<8x128xf32>
      tpu.vector_store %arg5[%c0_13, %c0_14], %15 {strides = array<i32>} : memref<8x128xf32, #tpu.memory_space<vmem>>, vector<8x128xf32>,
    } else {
    }
    return
  }
  func.func @transform_0(%arg0: i32, %arg1: i32) -> (i32, i32) {
    %c0_i32 = arith.constant 0 : i32
    return %arg0, %arg1 : i32, i32
  }
  func.func @transform_1(%arg0: i32, %arg1: i32) -> (i32, i32) {
    %c0_i32 = arith.constant 0 : i32
    %c0_i32_0 = arith.constant 0 : i32
    return %arg1, %c0_i32 : i32, i32
  }
  func.func @transform_2(%arg0: i32, %arg1: i32) -> (i32, i32) {
    %c0_i32 = arith.constant 0 : i32
    %c0_i32_0 = arith.constant 0 : i32
    %c0_i32_1 = arith.constant 0 : i32
    return %c0_i32, %c0_i32_0 : i32, i32
  }
  func.func @transform_3(%arg0: i32, %arg1: i32) -> (i32, i32) {
    %c0_i32 = arith.constant 0 : i32
    %c0_i32_0 = arith.constant 0 : i32
    return %arg0, %c0_i32 : i32, i32
  }
}

</mosaic_0001>

<bundles_post_ra>
// kernel: patch_discriminator_forward.10
= control target key start
LH: loop header
LB: loop body
LE: loop exit
PB: predicated region body
PF: predicated region fallthrough
CT: control target
= control target key end

     0   :  { %s804_s12 = smov 0   ;;  %s952_s0 = inlined_call_operand.vmem [shape: f32[512,128], index: 0, kind: input, shape index: {}]   ;;  %s953_s1 = inlined_call_operand.vmem [shape: f32[1,128], index: 1, kind: input, shape index: {}]   ;;  %s954_s2 = inlined_call_operand.vmem [shape: f32[1,128], index: 2, kind: input, shape index: {}]   ;;  %s955_s3 = inlined_call_operand.vmem [shape: bf16[512,128], index: 3, kind: output, shape index: {}]  }
   0x1 LB: > { %s596_s13 = sadd.s32 4294967295, %s782_s12   ;;  %p600_p0 = scmp.ge.s32.totalorder %s782_s12, 1  ;;  %s782_s12 = sphi %s804_s12, %s13_s12  }
   0x2   : > { %p138_p1 = scmp.lt.s32.totalorder %s782_s12, 3 }
   0x4   : > { %p139_p2 = pnand %p600_p0, %p138_p1 }
   0x5   : > { %s601_s14 = sshll.u32 (!%p139_p2), %s596_s13, 5  ;;  %v818_v0 = vld [vmem:[%s953_s1] ss:$0 sm:$0xff] (!%p139_p2) }
   0x6   : > { %142 = sbr.rel (%p139_p2) target bundleno = 67 (0x43), region = 32  ;;  %p163_p3 = scmp.lt.s32.totalorder (!%p139_p2), %s601_s14, 63  ;;  %v828_v1 = vld [vmem:[%s954_s2] ss:$0 sm:$0xff] (!%p139_p2) }
   0xd   : > { %s957_s14 = smov (!%p163_p3, %s601_s14), 63 }
   0xe   : > { %s602_s15 = sshll.u32 %s957_s14, 3  ;;  %s604_s23 = sshll.u32 %s957_s14, 2 }
   0xf   : > { %s823_s20 = scalar_lea.vmem %s952_s0, %s602_s15  ;;  %s856_s26 = scalar_lea.vmem %s955_s3, %s604_s23 }
  0x10   : > { %v174_v2 = vld [vmem:[%s823_s20] sm:$0xff]  ;;  %v175_v3 = vld [vmem:[%s823_s20 + $0x8] sm:$0xff]  ;;  %v176_v4 = vld [vmem:[%s823_s20 + $0x10] sm:$0xff] }
  0x11   : > { %v213_v5 = vmul.f32 %v818_v0, %v174_v2  ;;  %v214_v6 = vmul.f32 %v818_v0, %v175_v3  ;;  %v177_v7 = vld [vmem:[%s823_s20 + $0x18] sm:$0xff]  ;;  %v215_v8 = vmul.f32 %v818_v0, %v176_v4  ;;  %v178_v9 = vld [vmem:[%s823_s20 + $0x20] sm:$0xff]  ;;  %v179_v10 = vld [vmem:[%s823_s20 + $0x28] sm:$0xff] }
  0x12   : > { %v216_v11 = vmul.f32 %v818_v0, %v177_v7  ;;  %v217_v12 = vmul.f32 %v818_v0, %v178_v9  ;;  %v218_v13 = vmul.f32 %v818_v0, %v179_v10  ;;  %v180_v14 = vld [vmem:[%s823_s20 + $0x30] sm:$0xff]  ;;  %v181_v15 = vld [vmem:[%s823_s20 + $0x38] sm:$0xff]  ;;  %v182_v30 = vld [vmem:[%s823_s20 + $0x40] sm:$0xff] }
  0x13   : > { %v252_v16 = vadd.f32 %v828_v1, %v213_v5  ;;  %v253_v17 = vadd.f32 %v828_v1, %v214_v6  ;;  %v254_v18 = vadd.f32 %v828_v1, %v215_v8  ;;  %v219_v19 = vmul.f32 %v818_v0, %v180_v14  ;;  %v183_v31 = vld [vmem:[%s823_s20 + $0x48] sm:$0xff]  ;;  %v184_v32 = vld [vmem:[%s823_s20 + $0x50] sm:$0xff]  ;;  %v185_v44 = vld [vmem:[%s823_s20 + $0x58] sm:$0xff] }
  0x14   : > { %v255_v20 = vadd.f32 %v828_v1, %v216_v11  ;;  %v256_v21 = vadd.f32 %v828_v1, %v217_v12  ;;  %v257_v22 = vadd.f32 %v828_v1, %v218_v13  ;;  %v220_v23 = vmul.f32 %v818_v0, %v181_v15  ;;  %v186_v46 = vld [vmem:[%s823_s20 + $0x60] sm:$0xff]  ;;  %v187_v56 = vld [vmem:[%s823_s20 + $0x68] sm:$0xff]  ;;  %v188_v60 = vld [vmem:[%s823_s20 + $0x70] sm:$0xff] }
  0x15   : > { %vm284_vm0 = vcmp.ge.f32.partialorder %v252_v16, 0.0  ;;  %vm285_vm1 = vcmp.ge.f32.partialorder %v253_v17, 0.0  ;;  %v316_v24 = vmul.f32 0.2, %v252_v16  ;;  %v317_v25 = vmul.f32 0.2, %v253_v17 }
  0x16   : > { %vm286_vm2 = vcmp.ge.f32.partialorder %v254_v18, 0.0  ;;  %vm287_vm3 = vcmp.ge.f32.partialorder %v255_v20, 0.0  ;;  %v318_v26 = vmul.f32 0.2, %v254_v18  ;;  %v319_v27 = vmul.f32 0.2, %v255_v20 }
  0x17   : > { %v348_v28 = vsel %vm284_vm0, %v252_v16, %v316_v24  ;;  %v349_v29 = vsel %vm285_vm1, %v253_v17, %v317_v25  ;;  %vm288_vm4 = vcmp.ge.f32.partialorder %v256_v21, 0.0  ;;  %vm289_vm5 = vcmp.ge.f32.partialorder %v257_v22, 0.0  ;;  %v189_v6 = vld [vmem:[%s823_s20 + $0x78] sm:$0xff]  ;;  %v190_v10 = vld [vmem:[%s823_s20 + $0x80] sm:$0xff] }
  0x18   : > { %v676_v33 = vpack.c.bf16 %v349_v29, %v348_v28  ;;  %v350_v34 = vsel %vm286_vm2, %v254_v18, %v318_v26  ;;  %v351_v35 = vsel %vm287_vm3, %v255_v20, %v319_v27  ;;  %v320_v36 = vmul.f32 0.2, %v256_v21  ;;  %v191_v18 = vld [vmem:[%s823_s20 + $0x88] sm:$0xff]  ;;  %v193_v26 = vld [vmem:[%s823_s20 + $0x98] sm:$0xff] }
  0x19   : > { %v681_v37 = vpack.c.bf16 %v351_v35, %v350_v34  ;;  %v321_v38 = vmul.f32 0.2, %v257_v22  ;;  %v258_v39 = vadd.f32 %v828_v1, %v219_v19  ;;  %v259_v40 = vadd.f32 %v828_v1, %v220_v23  ;;  %v192_v19 = vld [vmem:[%s823_s20 + $0x90] sm:$0xff] }
  0x1a   : > { %677 = vst [vmem:[%s856_s26] sm:$0xff] %v676_v33   ;;  %v352_v41 = vsel %vm288_vm4, %v256_v21, %v320_v36  ;;  %v221_v42 = vmul.f32 %v818_v0, %v182_v30  ;;  %v222_v43 = vmul.f32 %v818_v0, %v183_v31  ;;  %v223_v45 = vmul.f32 %v818_v0, %v184_v32  ;;  %v194_v31 = vld [vmem:[%s823_s20 + $0xa0] sm:$0xff]  ;;  %v195_v32 = vld [vmem:[%s823_s20 + $0xa8] sm:$0xff] }
  0x1b   : > { %753 = vst [vmem:[%s856_s26 + $0x8] sm:$0xff] %v681_v37   ;;  %v353_v47 = vsel %vm289_vm5, %v257_v22, %v321_v38  ;;  %vm290_vm6 = vcmp.ge.f32.partialorder %v258_v39, 0.0  ;;  %vm291_vm7 = vcmp.ge.f32.partialorder %v259_v40, 0.0  ;;  %v322_v48 = vmul.f32 0.2, %v258_v39 }
  0x1c   : > { %v686_v49 = vpack.c.bf16 %v353_v47, %v352_v41  ;;  %v323_v50 = vmul.f32 0.2, %v259_v40  ;;  %v260_v51 = vadd.f32 %v828_v1, %v221_v42  ;;  %v261_v52 = vadd.f32 %v828_v1, %v222_v43  ;;  %v196_v43 = vld [vmem:[%s823_s20 + $0xb0] sm:$0xff] }
  0x1d   : > { %v354_v53 = vsel %vm290_vm6, %v258_v39, %v322_v48  ;;  %v224_v54 = vmul.f32 %v818_v0, %v185_v44  ;;  %v262_v55 = vadd.f32 %v828_v1, %v223_v45  ;;  %v225_v57 = vmul.f32 %v818_v0, %v186_v46  ;;  %v197_v44 = vld [vmem:[%s823_s20 + $0xb8] sm:$0xff] }
  0x1e   : > { %754 = vst [vmem:[%s856_s26 + $0x10] sm:$0xff] %v686_v49   ;;  %v355_v58 = vsel %vm291_vm7, %v259_v40, %v323_v50  ;;  %vm292_vm8 = vcmp.ge.f32.partialorder %v260_v51, 0.0  ;;  %vm293_vm9 = vcmp.ge.f32.partialorder %v261_v52, 0.0  ;;  %v324_v59 = vmul.f32 0.2, %v260_v51 }
  0x1f   : > { %v691_v61 = vpack.c.bf16 %v355_v58, %v354_v53  ;;  %v325_v62 = vmul.f32 0.2, %v261_v52  ;;  %v263_v63 = vadd.f32 %v828_v1, %v224_v54  ;;  %vm294_vm10 = vcmp.ge.f32.partialorder %v262_v55, 0.0 }
  0x20   : > { %v356_v2 = vsel %vm292_vm8, %v260_v51, %v324_v59  ;;  %v326_v3 = vmul.f32 0.2, %v262_v55  ;;  %v226_v4 = vmul.f32 %v818_v0, %v187_v56  ;;  %v264_v5 = vadd.f32 %v828_v1, %v225_v57  ;;  %v199_v59 = vld [vmem:[%s823_s20 + $0xc8] sm:$0xff] }
  0x21   : > { %755 = vst [vmem:[%s856_s26 + $0x18] sm:$0xff] %v691_v61   ;;  %v357_v7 = vsel %vm293_vm9, %v261_v52, %v325_v62  ;;  %vm295_vm11 = vcmp.ge.f32.partialorder %v263_v63, 0.0  ;;  %v327_v8 = vmul.f32 0.2, %v263_v63  ;;  %v227_v9 = vmul.f32 %v818_v0, %v188_v60 }
  0x22   : > { %v696_v11 = vpack.c.bf16 %v357_v7, %v356_v2  ;;  %v358_v12 = vsel %vm294_vm10, %v262_v55, %v326_v3  ;;  %v265_v13 = vadd.f32 %v828_v1, %v226_v4  ;;  %vm296_vm12 = vcmp.ge.f32.partialorder %v264_v5, 0.0  ;;  %v198_v55 = vld [vmem:[%s823_s20 + $0xc0] sm:$0xff]  ;;  %v200_v4 = vld [vmem:[%s823_s20 + $0xd0] sm:$0xff] }
  0x23   : > { %v359_v14 = vsel %vm295_vm11, %v263_v63, %v327_v8  ;;  %v328_v15 = vmul.f32 0.2, %v264_v5  ;;  %v228_v16 = vmul.f32 %v818_v0, %v189_v6  ;;  %v266_v17 = vadd.f32 %v828_v1, %v227_v9  ;;  %v201_v9 = vld [vmem:[%s823_s20 + $0xd8] sm:$0xff] }
  0x24   : > { %756 = vst [vmem:[%s856_s26 + $0x20] sm:$0xff] %v696_v11   ;;  %v701_v20 = vpack.c.bf16 %v359_v14, %v358_v12  ;;  %vm297_vm13 = vcmp.ge.f32.partialorder %v265_v13, 0.0  ;;  %v329_v21 = vmul.f32 0.2, %v265_v13  ;;  %v229_v22 = vmul.f32 %v818_v0, %v190_v10  ;;  %v202_v10 = vld [vmem:[%s823_s20 + $0xe0] sm:$0xff]  ;;  %v203_v11 = vld [vmem:[%s823_s20 + $0xe8] sm:$0xff] }
  0x25   : > { %v360_v23 = vsel %vm296_vm12, %v264_v5, %v328_v15  ;;  %v267_v24 = vadd.f32 %v828_v1, %v228_v16  ;;  %vm298_vm14 = vcmp.ge.f32.partialorder %v266_v17, 0.0  ;;  %v330_v25 = vmul.f32 0.2, %v266_v17 }
  0x26   : > { %757 = vst [vmem:[%s856_s26 + $0x28] sm:$0xff] %v701_v20   ;;  %v361_v27 = vsel %vm297_vm13, %v265_v13, %v329_v21  ;;  %v230_v28 = vmul.f32 %v818_v0, %v191_v18  ;;  %v268_v29 = vadd.f32 %v828_v1, %v229_v22  ;;  %v231_v30 = vmul.f32 %v818_v0, %v192_v19  ;;  %v204_v22 = vld [vmem:[%s823_s20 + $0xf0] sm:$0xff] }
  0x27   : > { %v706_v33 = vpack.c.bf16 %v361_v27, %v360_v23  ;;  %vm299_vm15 = vcmp.ge.f32.partialorder %v267_v24, 0.0  ;;  %v331_v34 = vmul.f32 0.2, %v267_v24  ;;  %v362_v35 = vsel %vm298_vm14, %v266_v17, %v330_v25 }
  0x28   : > { %v269_v36 = vadd.f32 %v828_v1, %v230_v28  ;;  %vm300_vm0 = vcmp.ge.f32.partialorder %v268_v29, 0.0  ;;  %v332_v37 = vmul.f32 0.2, %v268_v29  ;;  %v232_v38 = vmul.f32 %v818_v0, %v193_v26 }
  0x29   : > { %758 = vst [vmem:[%s856_s26 + $0x30] sm:$0xff] %v706_v33   ;;  %v363_v39 = vsel %vm299_vm15, %v267_v24, %v331_v34  ;;  %v270_v40 = vadd.f32 %v828_v1, %v231_v30  ;;  %v233_v41 = vmul.f32 %v818_v0, %v194_v31  ;;  %v234_v42 = vmul.f32 %v818_v0, %v195_v32  ;;  %v205_v32 = vld [vmem:[%s823_s20 + $0xf8] sm:$0xff] }
  0x2a   : > { %v711_v45 = vpack.c.bf16 %v363_v39, %v362_v35  ;;  %vm301_vm1 = vcmp.ge.f32.partialorder %v269_v36, 0.0  ;;  %v333_v46 = vmul.f32 0.2, %v269_v36  ;;  %v364_v47 = vsel %vm300_vm0, %v268_v29, %v332_v37 }
  0x2b   : > { %v271_v48 = vadd.f32 %v828_v1, %v232_v38  ;;  %vm302_vm2 = vcmp.ge.f32.partialorder %v270_v40, 0.0  ;;  %v334_v49 = vmul.f32 0.2, %v270_v40  ;;  %v272_v50 = vadd.f32 %v828_v1, %v233_v41 }
  0x2c   : > { %759 = vst [vmem:[%s856_s26 + $0x38] sm:$0xff] %v711_v45   ;;  %v365_v51 = vsel %vm301_vm1, %v269_v36, %v333_v46  ;;  %v273_v52 = vadd.f32 %v828_v1, %v234_v42  ;;  %v235_v53 = vmul.f32 %v818_v0, %v196_v43  ;;  %v236_v54 = vmul.f32 %v818_v0, %v197_v44 }
  0x2d   : > { %v716_v56 = vpack.c.bf16 %v365_v51, %v364_v47  ;;  %vm303_vm3 = vcmp.ge.f32.partialorder %v271_v48, 0.0  ;;  %v335_v57 = vmul.f32 0.2, %v271_v48  ;;  %v366_v58 = vsel %vm302_vm2, %v270_v40, %v334_v49 }
  0x2e   : > { %vm304_vm4 = vcmp.ge.f32.partialorder %v272_v50, 0.0  ;;  %vm305_vm5 = vcmp.ge.f32.partialorder %v273_v52, 0.0  ;;  %v336_v60 = vmul.f32 0.2, %v272_v50  ;;  %v337_v61 = vmul.f32 0.2, %v273_v52 }
  0x2f   : > { %760 = vst [vmem:[%s856_s26 + $0x40] sm:$0xff] %v716_v56   ;;  %v367_v62 = vsel %vm303_vm3, %v271_v48, %v335_v57  ;;  %v274_v63 = vadd.f32 %v828_v1, %v235_v53  ;;  %v275_v2 = vadd.f32 %v828_v1, %v236_v54  ;;  %v237_v3 = vmul.f32 %v818_v0, %v198_v55 }
  0x30   : > { %v721_v5 = vpack.c.bf16 %v367_v62, %v366_v58  ;;  %v368_v6 = vsel %vm304_vm4, %v272_v50, %v336_v60  ;;  %v369_v7 = vsel %vm305_vm5, %v273_v52, %v337_v61  ;;  %v238_v8 = vmul.f32 %v818_v0, %v199_v59 }
  0x31   : > { %v726_v12 = vpack.c.bf16 %v369_v7, %v368_v6  ;;  %vm306_vm6 = vcmp.ge.f32.partialorder %v274_v63, 0.0  ;;  %vm307_vm7 = vcmp.ge.f32.partialorder %v275_v2, 0.0  ;;  %v338_v13 = vmul.f32 0.2, %v274_v63 }
  0x32   : > { %761 = vst [vmem:[%s856_s26 + $0x48] sm:$0xff] %v721_v5   ;;  %v339_v14 = vmul.f32 0.2, %v275_v2  ;;  %v276_v15 = vadd.f32 %v828_v1, %v237_v3  ;;  %v277_v16 = vadd.f32 %v828_v1, %v238_v8  ;;  %v239_v17 = vmul.f32 %v818_v0, %v200_v4 }
  0x33   : > { %762 = vst [vmem:[%s856_s26 + $0x50] sm:$0xff] %v726_v12   ;;  %v370_v18 = vsel %vm306_vm6, %v274_v63, %v338_v13  ;;  %v240_v19 = vmul.f32 %v818_v0, %v201_v9  ;;  %v241_v20 = vmul.f32 %v818_v0, %v202_v10  ;;  %v242_v21 = vmul.f32 %v818_v0, %v203_v11 }
  0x34   : > { %v371_v23 = vsel %vm307_vm7, %v275_v2, %v339_v14  ;;  %vm308_vm8 = vcmp.ge.f32.partialorder %v276_v15, 0.0  ;;  %vm309_vm9 = vcmp.ge.f32.partialorder %v277_v16, 0.0  ;;  %v340_v24 = vmul.f32 0.2, %v276_v15 }
  0x35   : > { %v731_v25 = vpack.c.bf16 %v371_v23, %v370_v18  ;;  %v341_v26 = vmul.f32 0.2, %v277_v16  ;;  %v278_v27 = vadd.f32 %v828_v1, %v239_v17  ;;  %v279_v28 = vadd.f32 %v828_v1, %v240_v19 }
  0x36   : > { %v372_v29 = vsel %vm308_vm8, %v276_v15, %v340_v24  ;;  %v280_v30 = vadd.f32 %v828_v1, %v241_v20  ;;  %v281_v31 = vadd.f32 %v828_v1, %v242_v21  ;;  %v243_v33 = vmul.f32 %v818_v0, %v204_v22 }
  0x37   : > { %763 = vst [vmem:[%s856_s26 + $0x58] sm:$0xff] %v731_v25   ;;  %v373_v34 = vsel %vm309_vm9, %v277_v16, %v341_v26  ;;  %vm310_vm10 = vcmp.ge.f32.partialorder %v278_v27, 0.0  ;;  %vm311_vm11 = vcmp.ge.f32.partialorder %v279_v28, 0.0  ;;  %v342_v35 = vmul.f32 0.2, %v278_v27 }
  0x38   : > { %v736_v36 = vpack.c.bf16 %v373_v34, %v372_v29  ;;  %v343_v37 = vmul.f32 0.2, %v279_v28  ;;  %vm312_vm12 = vcmp.ge.f32.partialorder %v280_v30, 0.0  ;;  %vm313_vm13 = vcmp.ge.f32.partialorder %v281_v31, 0.0 }
  0x39   : > { %v374_v38 = vsel %vm310_vm10, %v278_v27, %v342_v35  ;;  %v344_v39 = vmul.f32 0.2, %v280_v30  ;;  %v345_v40 = vmul.f32 0.2, %v281_v31  ;;  %v244_v41 = vmul.f32 %v818_v0, %v205_v32 }
  0x3a   : > { %764 = vst [vmem:[%s856_s26 + $0x60] sm:$0xff] %v736_v36   ;;  %v375_v42 = vsel %vm311_vm11, %v279_v28, %v343_v37  ;;  %v282_v43 = vadd.f32 %v828_v1, %v243_v33 }
  0x3b   : > { %v741_v44 = vpack.c.bf16 %v375_v42, %v374_v38  ;;  %v376_v45 = vsel %vm312_vm12, %v280_v30, %v344_v39  ;;  %v377_v46 = vsel %vm313_vm13, %v281_v31, %v345_v40  ;;  %v283_v47 = vadd.f32 %v828_v1, %v244_v41 }
  0x3c   : > { %v746_v48 = vpack.c.bf16 %v377_v46, %v376_v45  ;;  %vm314_vm14 = vcmp.ge.f32.partialorder %v282_v43, 0.0  ;;  %v346_v49 = vmul.f32 0.2, %v282_v43 }
  0x3d   : > { %765 = vst [vmem:[%s856_s26 + $0x68] sm:$0xff] %v741_v44   ;;  %vm315_vm15 = vcmp.ge.f32.partialorder %v283_v47, 0.0  ;;  %v347_v50 = vmul.f32 0.2, %v283_v47 }
  0x3e   : > { %766 = vst [vmem:[%s856_s26 + $0x70] sm:$0xff] %v746_v48   ;;  %v378_v51 = vsel %vm314_vm14, %v282_v43, %v346_v49 }
  0x3f   : > { %v379_v52 = vsel %vm315_vm15, %v283_v47, %v347_v50 }
  0x40   : > { %v751_v0 = vpack.c.bf16 %v379_v52, %v378_v51 }
  0x42   : > { %767 = vst [vmem:[%s856_s26 + $0x78] sm:$0xff] %v751_v0  }
  0x43 PF: > { %s13_s12 = sadd.s32 1, %s782_s12  }
  0x44   : > { %p10_p4 = scmp.ge.s32.totalorder %s13_s12, 4  }
  0x46   :  { %12 = sbr.rel (!%p10_p4) target bundleno = 1 (0x1), region = 62 }

// kernel: patch_discriminator_forward.9
= control target key start
LH: loop header
LB: loop body
LE: loop exit
PB: predicated region body
PF: predicated region fallthrough
CT: control target
= control target key end

     0   :  { %s1278_s15 = smov 0   ;;  %s1280_s16 = smov 0   ;;  %s1480_s0 = inlined_call_operand.vmem [shape: bf16[512,128], index: 0, kind: input, shape index: {}]   ;;  %s1481_s1 = inlined_call_operand.vmem [shape: bf16[128,128], index: 1, kind: input, shape index: {}]   ;;  %s1482_s2 = inlined_call_operand.vmem [shape: f32[512,128], index: 2, kind: output, shape index: {0}]   ;;  %s1483_s3 = inlined_call_operand.vmem [shape: f32[2,1,128], index: 3, kind: output, shape index: {1}]   ;;  %s1484_s4 = inlined_call_operand.vmem [shape: f32[2,1,128], index: 4, kind: output, shape index: {2}]  }
   0x1   :  { %s1282_s17 = smov 0  }
   0x2 LB: > { %s27_s18 = sadd.s32 1, %s1247_s16  ;;  %p1062_p0 = scmp.ge.s32.totalorder %s1251_s17, 1  ;;  %s1251_s17 = sphi %s1282_s17, %s15_s17   ;;  %s1247_s16 = sphi %s1280_s16, %s1486_s16   ;;  %s1243_s15 = sphi %s1278_s15, %s1485_s15  }
   0x3   : > { %p29_p1 = scmp.ge.s32.totalorder %s27_s18, 2  ;;  %p196_p2 = scmp.lt.s32.totalorder %s1251_s17, 3 }
   0x5   : > { %s1488_s18 = smov (%p29_p1, %s27_s18), 0  ;;  %p197_p3 = pnand %p1062_p0, %p196_p2 }
   0x6   : > { %v1205_v0 = vld [vmem:[%s1481_s1] sm:$0xff] (!%p197_p3)   ;;  %s1063_s21 = sshll.u32 (!%p197_p3), %s1243_s15, 5  ;;  %v1206_v1 = vld [vmem:[%s1481_s1 + $0x8] sm:$0xff] (!%p197_p3)   ;;  %v1207_v2 = vld [vmem:[%s1481_s1 + $0x10] sm:$0xff] (!%p197_p3)   ;;  %p257_p5 = scmp.lt.s32.totalorder (!%p197_p3), %s1243_s15, 1 }
   0x7   : > { %200 = sbr.rel (%p197_p3) target bundleno = 331 (0x14b), region = 28  ;;  %p237_p4 = scmp.lt.s32.totalorder (!%p197_p3), %s1063_s21, 63  ;;  %1117 = vmatprep.subr.bf16.mxu0 (!%p197_p3), %v1205_v0  ;;  %1165 = vmatprep.subr.bf16.mxu1 (!%p197_p3), %v1205_v0  ;;  %v1208_v3 = vld [vmem:[%s1481_s1 + $0x18] sm:$0xff] (!%p197_p3)   ;;  %v1209_v5 = vld [vmem:[%s1481_s1 + $0x20] sm:$0xff] (!%p197_p3)   ;;  %v1210_v6 = vld [vmem:[%s1481_s1 + $0x28] sm:$0xff] (!%p197_p3)  }
   0x8   : > { %1118 = vmatpush3.bf16.msra.mxu0 (!%p197_p3), %v1205_v0  ;;  %1173 = vmatpush3.bf16.msra.mxu1 (!%p197_p3), %v1205_v0  ;;  %v1211_v8 = vld [vmem:[%s1481_s1 + $0x30] sm:$0xff] (!%p197_p3)   ;;  %v1212_v9 = vld [vmem:[%s1481_s1 + $0x38] sm:$0xff] (!%p197_p3)  }
   0x9   : > { %1119 = vmatprep.subr.bf16.mxu0 (!%p197_p3), %v1206_v1  ;;  %1166 = vmatprep.subr.bf16.mxu1 (!%p197_p3), %v1206_v1 }
   0xc   : > { %1120 = vmatpush3.bf16.msra.mxu0 (!%p197_p3), %v1206_v1  ;;  %1174 = vmatpush3.bf16.msra.mxu1 (!%p197_p3), %v1206_v1 }
   0xd   : > { %1121 = vmatprep.subr.bf16.mxu0 (!%p197_p3), %v1207_v2  ;;  %1167 = vmatprep.subr.bf16.mxu1 (!%p197_p3), %v1207_v2 }
   0xe   : > { %s1490_s21 = smov (!%p237_p4, %s1063_s21), 63  ;;  %s1492_s15 = smov (!%p257_p5, %s1243_s15), 1 }
   0xf   : > { %s1064_s26 = sshll.u32 %s1490_s21, 2  ;;  %s1066_s14 = sshll.u32 %s1490_s21, 3 }
  0x10   : > { %s1314_s29 = scalar_lea.vmem %s1480_s0, %s1064_s26  ;;  %1122 = vmatpush3.bf16.msra.mxu0 %v1207_v2  ;;  %1175 = vmatpush3.bf16.msra.mxu1 %v1207_v2  ;;  %s1351_s22 = scalar_lea.vmem %s1482_s2, %s1066_s14 }
  0x11   : > { %v1213_v4 = vld [vmem:[%s1314_s29] sm:$0xff]   ;;  %1123 = vmatprep.subr.bf16.mxu0 %v1208_v3  ;;  %1168 = vmatprep.subr.bf16.mxu1 %v1208_v3  ;;  %v1214_v10 = vld [vmem:[%s1314_s29 + $0x8] sm:$0xff]   ;;  %v1215_v12 = vld [vmem:[%s1314_s29 + $0x10] sm:$0xff]   ;;  %s259_s24 = scalar_lea.vmem %s1483_s3, %s1492_s15  ;;  %s262_s27 = scalar_lea.vmem %s1484_s4, %s1492_s15 }
  0x12   : > { %1133 = vmatprep.mubr.bf16.mxu0 %v1213_v4  ;;  %v1221_v7 = vld [vmem:[%s1314_s29 + $0x40] sm:$0xff]   ;;  %v1222_v11 = vld [vmem:[%s1314_s29 + $0x48] sm:$0xff]   ;;  %v1223_v13 = vld [vmem:[%s1314_s29 + $0x50] sm:$0xff]  }
  0x13   : > { %1149 = vmatprep.mubr.bf16.mxu1 %v1221_v7  ;;  %v1216_v14 = vld [vmem:[%s1314_s29 + $0x18] sm:$0xff]   ;;  %v1217_v16 = vld [vmem:[%s1314_s29 + $0x20] sm:$0xff]   ;;  %v1218_v18 = vld [vmem:[%s1314_s29 + $0x28] sm:$0xff]  }
  0x14   : > { %1124 = vmatpush3.bf16.msra.mxu0 %v1208_v3  ;;  %1176 = vmatpush3.bf16.msra.mxu1 %v1208_v3  ;;  %v1224_v15 = vld [vmem:[%s1314_s29 + $0x58] sm:$0xff]   ;;  %v1225_v17 = vld [vmem:[%s1314_s29 + $0x60] sm:$0xff]   ;;  %v1226_v19 = vld [vmem:[%s1314_s29 + $0x68] sm:$0xff]  }
  0x15   : > { %1125 = vmatprep.subr.bf16.mxu0 %v1209_v5  ;;  %1169 = vmatprep.subr.bf16.mxu1 %v1209_v5  ;;  %v1219_v20 = vld [vmem:[%s1314_s29 + $0x30] sm:$0xff]   ;;  %v1220_v22 = vld [vmem:[%s1314_s29 + $0x38] sm:$0xff]  }
  0x16   : > { %v1227_v21 = vld [vmem:[%s1314_s29 + $0x70] sm:$0xff]   ;;  %v1228_v23 = vld [vmem:[%s1314_s29 + $0x78] sm:$0xff]  }
  0x18   : > { %1126 = vmatpush3.bf16.msra.mxu0 %v1209_v5  ;;  %1177 = vmatpush3.bf16.msra.mxu1 %v1209_v5 }
  0x19   : > { %1127 = vmatprep.subr.bf16.mxu0 %v1210_v6  ;;  %1170 = vmatprep.subr.bf16.mxu1 %v1210_v6 }
  0x1c   : > { %1128 = vmatpush3.bf16.msra.mxu0 %v1210_v6  ;;  %1178 = vmatpush3.bf16.msra.mxu1 %v1210_v6 }
  0x1d   : > { %1129 = vmatprep.subr.bf16.mxu0 %v1211_v8  ;;  %1171 = vmatprep.subr.bf16.mxu1 %v1211_v8 }
  0x20   : > { %1130 = vmatpush3.bf16.msra.mxu0 %v1211_v8  ;;  %1179 = vmatpush3.bf16.msra.mxu1 %v1211_v8 }
  0x21   : > { %1131 = vmatprep.subr.bf16.mxu0 %v1212_v9  ;;  %1172 = vmatprep.subr.bf16.mxu1 %v1212_v9 }
  0x24   : > { %1132 = vmatpush3.bf16.msra.mxu0 %v1212_v9  ;;  %1180 = vmatpush3.bf16.msra.mxu1 %v1212_v9 }
  0x27   : > { %1134 = vmatmul.mubr.bf16.vlgmr.msra.gmra.mrb[0].mxu0 %v1214_v10  ;;  %1150 = vmatmul.mubr.bf16.vlgmr.msra.gmra.mrb[0].mxu1 %v1222_v11 }
  0x28   : > { %1137 = vmatprep.mubr.bf16.mxu0 %v1215_v12  ;;  %1153 = vmatprep.mubr.bf16.mxu1 %v1223_v13 }
  0x2f   : > { %1138 = vmatmul.mubr.bf16.gmra.mrb[4].mxu0 %v1216_v14  ;;  %1154 = vmatmul.mubr.bf16.gmra.mrb[4].mxu1 %v1224_v15 }
  0x30   : > { %1141 = vmatprep.mubr.bf16.mxu0 %v1217_v16  ;;  %1157 = vmatprep.mubr.bf16.mxu1 %v1225_v17 }
  0x37   : > { %1142 = vmatmul.mubr.bf16.gmra.mrb[8].mxu0 %v1218_v18  ;;  %1158 = vmatmul.mubr.bf16.gmra.mrb[8].mxu1 %v1226_v19 }
  0x38   : > { %1145 = vmatprep.mubr.bf16.mxu0 %v1219_v20  ;;  %1161 = vmatprep.mubr.bf16.mxu1 %v1227_v21 }
  0x3f   : > { %1146 = vmatmul.mubr.bf16.gmra.mrb[12].mxu0 %v1220_v22  ;;  %1162 = vmatmul.mubr.bf16.gmra.mrb[12].mxu1 %v1228_v23 }
  0xfa   : > { %v1135_v24 = vpop.f32.mrb[0].mxu0  ;;  %v1353_v25 = vpop.f32.mrb[0].mxu1 }
  0xfb   : > { %786 = vst [vmem:[%s1351_s22 + $0x10] sm:$0xff] %v1135_v24  ;;  %v558_v26 = vpop.f32.mrb[1].mxu0  ;;  %802 = vst [vmem:[%s1351_s22 + $0x90] sm:$0xff] %v1353_v25  ;;  %v1358_v27 = vpop.f32.mrb[1].mxu1  ;;  %v856_v35 = vmul.f32 %v1135_v24, %v1135_v24 }
  0xfc   : > { %784 = vst [vmem:[%s1351_s22] sm:$0xff] %v558_v26  ;;  %v1136_v28 = vpop.f32.mrb[2].mxu0  ;;  %800 = vst [vmem:[%s1351_s22 + $0x80] sm:$0xff] %v1358_v27  ;;  %v1363_v29 = vpop.f32.mrb[2].mxu1  ;;  %v854_v32 = vmul.f32 %v558_v26, %v558_v26 }
  0xfd   : > { %787 = vst [vmem:[%s1351_s22 + $0x18] sm:$0xff] %v1136_v28  ;;  %v561_v30 = vpop.f32.mrb[3].mxu0  ;;  %803 = vst [vmem:[%s1351_s22 + $0x98] sm:$0xff] %v1363_v29  ;;  %v1368_v31 = vpop.f32.mrb[3].mxu1  ;;  %v857_v38 = vmul.f32 %v1136_v28, %v1136_v28 }
  0xfe   : > { %785 = vst [vmem:[%s1351_s22 + $0x8] sm:$0xff] %v561_v30  ;;  %v816_v33 = vadd.f32 %v561_v30, %v558_v26  ;;  %v855_v34 = vmul.f32 %v561_v30, %v561_v30  ;;  %801 = vst [vmem:[%s1351_s22 + $0x88] sm:$0xff] %v1368_v31 }
 0x100   : > { %v817_v36 = vadd.f32 %v1135_v24, %v816_v33  ;;  %v886_v37 = vadd.f32 %v855_v34, %v854_v32 }
 0x102   : > { %v887_v39 = vadd.f32 %v886_v37, %v856_v35  ;;  %v1139_v40 = vpop.f32.mrb[4].mxu0  ;;  %v818_v41 = vadd.f32 %v1136_v28, %v817_v36  ;;  %v1373_v42 = vpop.f32.mrb[4].mxu1 }
 0x103   : > { %790 = vst [vmem:[%s1351_s22 + $0x30] sm:$0xff] %v1139_v40  ;;  %v574_v43 = vpop.f32.mrb[5].mxu0  ;;  %806 = vst [vmem:[%s1351_s22 + $0xb0] sm:$0xff] %v1373_v42  ;;  %v1378_v44 = vpop.f32.mrb[5].mxu1  ;;  %v860_v55 = vmul.f32 %v1139_v40, %v1139_v40 }
 0x104   : > { %788 = vst [vmem:[%s1351_s22 + $0x20] sm:$0xff] %v574_v43  ;;  %v819_v45 = vadd.f32 %v818_v41, %v574_v43  ;;  %v858_v46 = vmul.f32 %v574_v43, %v574_v43  ;;  %v888_v47 = vadd.f32 %v887_v39, %v857_v38  ;;  %v1140_v48 = vpop.f32.mrb[6].mxu0  ;;  %804 = vst [vmem:[%s1351_s22 + $0xa0] sm:$0xff] %v1378_v44  ;;  %v1383_v49 = vpop.f32.mrb[6].mxu1 }
 0x105   : > { %791 = vst [vmem:[%s1351_s22 + $0x38] sm:$0xff] %v1140_v48  ;;  %v577_v50 = vpop.f32.mrb[7].mxu0  ;;  %807 = vst [vmem:[%s1351_s22 + $0xb8] sm:$0xff] %v1383_v49  ;;  %v1388_v51 = vpop.f32.mrb[7].mxu1  ;;  %v861_v58 = vmul.f32 %v1140_v48, %v1140_v48  ;;  %v870_v41 = vmul.f32 %v1358_v27, %v1358_v27 }
 0x106   : > { %v889_v52 = vadd.f32 %v888_v47, %v858_v46  ;;  %789 = vst [vmem:[%s1351_s22 + $0x28] sm:$0xff] %v577_v50  ;;  %v820_v53 = vadd.f32 %v819_v45, %v577_v50  ;;  %v859_v54 = vmul.f32 %v577_v50, %v577_v50  ;;  %805 = vst [vmem:[%s1351_s22 + $0xa8] sm:$0xff] %v1388_v51 }
 0x107   : > { %v872_v50 = vmul.f32 %v1353_v25, %v1353_v25 }
 0x108   : > { %v821_v56 = vadd.f32 %v1139_v40, %v820_v53  ;;  %v890_v57 = vadd.f32 %v889_v52, %v859_v54  ;;  %v873_v54 = vmul.f32 %v1363_v29, %v1363_v29 }
 0x10a   : > { %v891_v59 = vadd.f32 %v890_v57, %v860_v55  ;;  %v1143_v60 = vpop.f32.mrb[8].mxu0  ;;  %v822_v61 = vadd.f32 %v1140_v48, %v821_v56  ;;  %v1393_v62 = vpop.f32.mrb[8].mxu1  ;;  %v871_v48 = vmul.f32 %v1368_v31, %v1368_v31 }
 0x10b   : > { %794 = vst [vmem:[%s1351_s22 + $0x50] sm:$0xff] %v1143_v60  ;;  %v590_v63 = vpop.f32.mrb[9].mxu0  ;;  %810 = vst [vmem:[%s1351_s22 + $0xd0] sm:$0xff] %v1393_v62  ;;  %v1398_v0 = vpop.f32.mrb[9].mxu1  ;;  %v864_v11 = vmul.f32 %v1143_v60, %v1143_v60 }
 0x10c   : > { %792 = vst [vmem:[%s1351_s22 + $0x40] sm:$0xff] %v590_v63  ;;  %v823_v1 = vadd.f32 %v822_v61, %v590_v63  ;;  %v862_v2 = vmul.f32 %v590_v63, %v590_v63  ;;  %v892_v3 = vadd.f32 %v891_v59, %v861_v58  ;;  %v1144_v4 = vpop.f32.mrb[10].mxu0  ;;  %808 = vst [vmem:[%s1351_s22 + $0xc0] sm:$0xff] %v1398_v0  ;;  %v1403_v5 = vpop.f32.mrb[10].mxu1 }
 0x10d   : > { %795 = vst [vmem:[%s1351_s22 + $0x58] sm:$0xff] %v1144_v4  ;;  %v593_v6 = vpop.f32.mrb[11].mxu0  ;;  %811 = vst [vmem:[%s1351_s22 + $0xd8] sm:$0xff] %v1403_v5  ;;  %v1408_v7 = vpop.f32.mrb[11].mxu1  ;;  %v865_v14 = vmul.f32 %v1144_v4, %v1144_v4 }
 0x10e   : > { %v893_v8 = vadd.f32 %v892_v3, %v862_v2  ;;  %793 = vst [vmem:[%s1351_s22 + $0x48] sm:$0xff] %v593_v6  ;;  %v824_v9 = vadd.f32 %v823_v1, %v593_v6  ;;  %v863_v10 = vmul.f32 %v593_v6, %v593_v6  ;;  %809 = vst [vmem:[%s1351_s22 + $0xc8] sm:$0xff] %v1408_v7 }
 0x110   : > { %v825_v12 = vadd.f32 %v1143_v60, %v824_v9  ;;  %v894_v13 = vadd.f32 %v893_v8, %v863_v10  ;;  %v875_v60 = vmul.f32 %v1388_v51, %v1388_v51  ;;  %v879_v8 = vmul.f32 %v1408_v7, %v1408_v7 }
 0x112   : > { %v895_v15 = vadd.f32 %v894_v13, %v864_v11  ;;  %v1147_v16 = vpop.f32.mrb[12].mxu0  ;;  %v826_v17 = vadd.f32 %v1144_v4, %v825_v12  ;;  %v1413_v18 = vpop.f32.mrb[12].mxu1 }
 0x113   : > { %798 = vst [vmem:[%s1351_s22 + $0x70] sm:$0xff] %v1147_v16  ;;  %v606_v19 = vpop.f32.mrb[13].mxu0  ;;  %814 = vst [vmem:[%s1351_s22 + $0xf0] sm:$0xff] %v1413_v18  ;;  %v670_v20 = vpop.f32.mrb[13].mxu1  ;;  %v868_v35 = vmul.f32 %v1147_v16, %v1147_v16 }
 0x114   : > { %796 = vst [vmem:[%s1351_s22 + $0x60] sm:$0xff] %v606_v19  ;;  %v827_v21 = vadd.f32 %v826_v17, %v606_v19  ;;  %v866_v22 = vmul.f32 %v606_v19, %v606_v19  ;;  %v896_v23 = vadd.f32 %v895_v15, %v865_v14  ;;  %v1148_v24 = vpop.f32.mrb[14].mxu0  ;;  %812 = vst [vmem:[%s1351_s22 + $0xe0] sm:$0xff] %v670_v20  ;;  %v1164_v26 = vpop.f32.mrb[14].mxu1 }
 0x115   : > { %799 = vst [vmem:[%s1351_s22 + $0x78] sm:$0xff] %v1148_v24  ;;  %v609_v28 = vpop.f32.mrb[15].mxu0  ;;  %815 = vst [vmem:[%s1351_s22 + $0xf8] sm:$0xff] %v1164_v26  ;;  %v673_v30 = vpop.f32.mrb[15].mxu1  ;;  %v869_v38 = vmul.f32 %v1148_v24, %v1148_v24  ;;  %v882_v12 = vmul.f32 %v670_v20, %v670_v20  ;;  %v884_v17 = vmul.f32 %v1413_v18, %v1413_v18 }
 0x116   : > { %v897_v32 = vadd.f32 %v896_v23, %v866_v22  ;;  %797 = vst [vmem:[%s1351_s22 + $0x68] sm:$0xff] %v609_v28  ;;  %v828_v33 = vadd.f32 %v827_v21, %v609_v28  ;;  %v867_v34 = vmul.f32 %v609_v28, %v609_v28  ;;  %813 = vst [vmem:[%s1351_s22 + $0xe8] sm:$0xff] %v673_v30 }
 0x117   : > { %v885_v21 = vmul.f32 %v1164_v26, %v1164_v26 }
 0x118   : > { %v829_v36 = vadd.f32 %v1147_v16, %v828_v33  ;;  %v898_v37 = vadd.f32 %v897_v32, %v867_v34 }
 0x11a   : > { %v899_v39 = vadd.f32 %v898_v37, %v868_v35  ;;  %v830_v40 = vadd.f32 %v1148_v24, %v829_v36 }
 0x11c   : > { %v831_v43 = vadd.f32 %v830_v40, %v1358_v27  ;;  %v900_v45 = vadd.f32 %v899_v39, %v869_v38  ;;  %v874_v27 = vmul.f32 %v1378_v44, %v1378_v44 }
 0x11e   : > { %v901_v46 = vadd.f32 %v900_v45, %v870_v41  ;;  %v832_v47 = vadd.f32 %v831_v43, %v1368_v31 }
 0x120   : > { %v833_v52 = vadd.f32 %v1353_v25, %v832_v47  ;;  %v902_v53 = vadd.f32 %v901_v46, %v871_v48  ;;  %v876_v25 = vmul.f32 %v1373_v42, %v1373_v42 }
 0x122   : > { %v903_v55 = vadd.f32 %v902_v53, %v872_v50  ;;  %v834_v56 = vadd.f32 %v1363_v29, %v833_v52  ;;  %v877_v29 = vmul.f32 %v1383_v49, %v1383_v49 }
 0x124   : > { %v835_v57 = vadd.f32 %v834_v56, %v1378_v44  ;;  %v904_v58 = vadd.f32 %v903_v55, %v873_v54  ;;  %v878_v44 = vmul.f32 %v1398_v0, %v1398_v0 }
 0x126   : > { %v905_v59 = vadd.f32 %v904_v58, %v874_v27  ;;  %v836_v31 = vadd.f32 %v835_v57, %v1388_v51 }
 0x128   : > { %v837_v61 = vadd.f32 %v1373_v42, %v836_v31  ;;  %v906_v63 = vadd.f32 %v905_v59, %v875_v60  ;;  %v880_v42 = vmul.f32 %v1393_v62, %v1393_v62 }
 0x12a   : > { %v907_v1 = vadd.f32 %v906_v63, %v876_v25  ;;  %v838_v2 = vadd.f32 %v1383_v49, %v837_v61  ;;  %v881_v49 = vmul.f32 %v1403_v5, %v1403_v5 }
 0x12c   : > { %v839_v3 = vadd.f32 %v838_v2, %v1398_v0  ;;  %v908_v4 = vadd.f32 %v907_v1, %v877_v29 }
 0x12e   : > { %v909_v6 = vadd.f32 %v908_v4, %v878_v44  ;;  %v840_v51 = vadd.f32 %v839_v3, %v1408_v7  ;;  %v883_v7 = vmul.f32 %v673_v30, %v673_v30 }
 0x130   : > { %v841_v9 = vadd.f32 %v1393_v62, %v840_v51  ;;  %v910_v10 = vadd.f32 %v909_v6, %v879_v8 }
 0x132   : > { %v911_v11 = vadd.f32 %v910_v10, %v880_v42  ;;  %v842_v0 = vadd.f32 %v1403_v5, %v841_v9 }
 0x134   : > { %v843_v13 = vadd.f32 %v842_v0, %v670_v20  ;;  %v912_v14 = vadd.f32 %v911_v11, %v881_v49 }
 0x136   : > { %v913_v15 = vadd.f32 %v912_v14, %v882_v12  ;;  %v844_v16 = vadd.f32 %v843_v13, %v673_v30 }
 0x138   : > { %v845_v62 = vadd.f32 %v1413_v18, %v844_v16  ;;  %v914_v19 = vadd.f32 %v913_v15, %v883_v7 }
 0x13a   : > { %v846_v22 = vadd.f32 %v1164_v26, %v845_v62  ;;  %v915_v23 = vadd.f32 %v914_v19, %v884_v17 }
 0x13c   : > { %v847_v24 = vrot.slane %v846_v22, 4  ;;  %v916_v28 = vadd.f32 %v915_v23, %v885_v21 }
 0x13e   : > { %v848_v5 = vadd.f32 %v847_v24, %v846_v22  ;;  %v917_v32 = vrot.slane %v916_v28, 4 }
 0x140   : > { %v849_v20 = vrot.slane %v848_v5, 2  ;;  %v918_v33 = vadd.f32 %v917_v32, %v916_v28 }
 0x142   : > { %v850_v34 = vadd.f32 %v849_v20, %v848_v5  ;;  %v919_v35 = vrot.slane %v918_v33, 2 }
 0x144   : > { %v851_v30 = vrot.slane %v850_v34, 1  ;;  %v920_v36 = vadd.f32 %v919_v35, %v918_v33 }
 0x146   : > { %v852_v18 = vadd.f32 %v851_v30, %v850_v34  ;;  %v921_v37 = vrot.slane %v920_v36, 1 }
 0x148   : > { %853 = vst [vmem:[%s259_s24] sm:$0x1] %v852_v18  ;;  %v922_v26 = vadd.f32 %v921_v37, %v920_v36 }
 0x14a   : > { %923 = vst [vmem:[%s262_s27] sm:$0x1] %v922_v26 }
 0x14b PF: > { %s15_s17 = sadd.s32 1, %s1251_s17   ;;  %s1485_s15 = smov %s1247_s16 }
 0x14c   : > { %p12_p6 = scmp.ge.s32.totalorder %s15_s17, 4   ;;  %s1486_s16 = smov %s1488_s18 }
 0x14e   :  { %14 = sbr.rel (!%p12_p6) target bundleno = 2 (0x2), region = 93 }

// kernel: patch_discriminator_forward.12
= control target key start
LH: loop header
LB: loop body
LE: loop exit
PB: predicated region body
PF: predicated region fallthrough
CT: control target
= control target key end

     0   :  { %s423_s0 = inlined_call_operand.vmem [shape: f32[128,128], index: 0, kind: input, shape index: {}]   ;;  %s424_s1 = inlined_call_operand.vmem [shape: f32[1,128], index: 1, kind: input, shape index: {}]   ;;  %s425_s2 = inlined_call_operand.vmem [shape: f32[1,128], index: 2, kind: input, shape index: {}]   ;;  %s426_s3 = inlined_call_operand.vmem [shape: bf16[128,128], index: 3, kind: output, shape index: {}]  }
   0x1   :  { %v14_v0 = vld [vmem:[%s423_s0] sm:$0xff]  ;;  %v15_v1 = vld [vmem:[%s423_s0 + $0x8] sm:$0xff]  ;;  %v16_v6 = vld [vmem:[%s423_s0 + $0x10] sm:$0xff] }
   0x2   :  { %v318_v2 = vld [vmem:[%s424_s1] ss:$0 sm:$0xff]  ;;  %v17_v7 = vld [vmem:[%s423_s0 + $0x18] sm:$0xff]  ;;  %v19_v11 = vld [vmem:[%s423_s0 + $0x28] sm:$0xff] }
   0x3   :  { %v37_v3 = vmul.f32 %v318_v2, %v14_v0  ;;  %v38_v4 = vmul.f32 %v318_v2, %v15_v1  ;;  %v325_v5 = vld [vmem:[%s425_s2] ss:$0 sm:$0xff]  ;;  %v39_v8 = vmul.f32 %v318_v2, %v16_v6  ;;  %v40_v9 = vmul.f32 %v318_v2, %v17_v7  ;;  %v20_v12 = vld [vmem:[%s423_s0 + $0x30] sm:$0xff]  ;;  %v21_v17 = vld [vmem:[%s423_s0 + $0x38] sm:$0xff] }
   0x4   :  { %v18_v10 = vld [vmem:[%s423_s0 + $0x20] sm:$0xff]  ;;  %v42_v16 = vmul.f32 %v318_v2, %v19_v11  ;;  %v43_v20 = vmul.f32 %v318_v2, %v20_v12  ;;  %v44_v21 = vmul.f32 %v318_v2, %v21_v17  ;;  %v23_v35 = vld [vmem:[%s423_s0 + $0x48] sm:$0xff]  ;;  %v24_v36 = vld [vmem:[%s423_s0 + $0x50] sm:$0xff] }
   0x5   :  { %v60_v13 = vadd.f32 %v325_v5, %v37_v3  ;;  %v61_v14 = vadd.f32 %v325_v5, %v38_v4  ;;  %v41_v15 = vmul.f32 %v318_v2, %v18_v10  ;;  %v62_v18 = vadd.f32 %v325_v5, %v39_v8  ;;  %v22_v34 = vld [vmem:[%s423_s0 + $0x40] sm:$0xff]  ;;  %v25_v42 = vld [vmem:[%s423_s0 + $0x58] sm:$0xff]  ;;  %v27_v48 = vld [vmem:[%s423_s0 + $0x68] sm:$0xff] }
   0x6   :  { %v63_v19 = vadd.f32 %v325_v5, %v40_v9  ;;  %v65_v29 = vadd.f32 %v325_v5, %v42_v16  ;;  %v66_v33 = vadd.f32 %v325_v5, %v43_v20  ;;  %v67_v40 = vadd.f32 %v325_v5, %v44_v21  ;;  %v26_v47 = vld [vmem:[%s423_s0 + $0x60] sm:$0xff]  ;;  %v28_v60 = vld [vmem:[%s423_s0 + $0x70] sm:$0xff]  ;;  %v29_v7 = vld [vmem:[%s423_s0 + $0x78] sm:$0xff] }
   0x7   :  { %vm76_vm0 = vcmp.ge.f32.partialorder %v60_v13, 0.0  ;;  %vm77_vm1 = vcmp.ge.f32.partialorder %v61_v14, 0.0  ;;  %v92_v22 = vmul.f32 0.2, %v60_v13  ;;  %v93_v23 = vmul.f32 0.2, %v61_v14 }
   0x8   :  { %vm78_vm2 = vcmp.ge.f32.partialorder %v62_v18, 0.0  ;;  %vm79_vm3 = vcmp.ge.f32.partialorder %v63_v19, 0.0  ;;  %v94_v24 = vmul.f32 0.2, %v62_v18  ;;  %v95_v25 = vmul.f32 0.2, %v63_v19 }
   0x9   :  { %v108_v26 = vsel %vm76_vm0, %v60_v13, %v92_v22  ;;  %v109_v27 = vsel %vm77_vm1, %v61_v14, %v93_v23  ;;  %v64_v28 = vadd.f32 %v325_v5, %v41_v15  ;;  %vm81_vm5 = vcmp.ge.f32.partialorder %v65_v29, 0.0 }
   0xa   :  { %v245_v30 = vpack.c.bf16 %v109_v27, %v108_v26  ;;  %v110_v31 = vsel %vm78_vm2, %v62_v18, %v94_v24  ;;  %v111_v32 = vsel %vm79_vm3, %v63_v19, %v95_v25  ;;  %v97_v39 = vmul.f32 0.2, %v65_v29 }
   0xb   :  { %v250_v37 = vpack.c.bf16 %v111_v32, %v110_v31  ;;  %vm80_vm4 = vcmp.ge.f32.partialorder %v64_v28, 0.0  ;;  %v96_v38 = vmul.f32 0.2, %v64_v28  ;;  %vm82_vm6 = vcmp.ge.f32.partialorder %v66_v33, 0.0 }
   0xc   :  { %246 = vst [vmem:[%s426_s3] sm:$0xff] %v245_v30   ;;  %v98_v41 = vmul.f32 0.2, %v66_v33  ;;  %v45_v44 = vmul.f32 %v318_v2, %v22_v34  ;;  %v46_v45 = vmul.f32 %v318_v2, %v23_v35  ;;  %v47_v46 = vmul.f32 %v318_v2, %v24_v36 }
   0xd   :  { %282 = vst [vmem:[%s426_s3 + $0x8] sm:$0xff] %v250_v37   ;;  %v112_v43 = vsel %vm80_vm4, %v64_v28, %v96_v38  ;;  %v113_v49 = vsel %vm81_vm5, %v65_v29, %v97_v39  ;;  %vm83_vm7 = vcmp.ge.f32.partialorder %v67_v40, 0.0  ;;  %v99_v50 = vmul.f32 0.2, %v67_v40 }
   0xe   :  { %v114_v51 = vsel %vm82_vm6, %v66_v33, %v98_v41  ;;  %v255_v52 = vpack.c.bf16 %v113_v49, %v112_v43  ;;  %v68_v53 = vadd.f32 %v325_v5, %v45_v44  ;;  %v69_v54 = vadd.f32 %v325_v5, %v46_v45 }
   0xf   :  { %v48_v55 = vmul.f32 %v318_v2, %v25_v42  ;;  %v115_v56 = vsel %vm83_vm7, %v67_v40, %v99_v50  ;;  %v70_v57 = vadd.f32 %v325_v5, %v47_v46  ;;  %v49_v58 = vmul.f32 %v318_v2, %v26_v47 }
  0x10   :  { %v50_v59 = vmul.f32 %v318_v2, %v27_v48  ;;  %283 = vst [vmem:[%s426_s3 + $0x10] sm:$0xff] %v255_v52   ;;  %v260_v61 = vpack.c.bf16 %v115_v56, %v114_v51  ;;  %vm84_vm8 = vcmp.ge.f32.partialorder %v68_v53, 0.0  ;;  %vm85_vm9 = vcmp.ge.f32.partialorder %v69_v54, 0.0 }
  0x11   :  { %v100_v62 = vmul.f32 0.2, %v68_v53  ;;  %v101_v63 = vmul.f32 0.2, %v69_v54  ;;  %v71_v0 = vadd.f32 %v325_v5, %v48_v55  ;;  %vm86_vm10 = vcmp.ge.f32.partialorder %v70_v57, 0.0 }
  0x12   :  { %v102_v1 = vmul.f32 0.2, %v70_v57  ;;  %284 = vst [vmem:[%s426_s3 + $0x18] sm:$0xff] %v260_v61   ;;  %v72_v4 = vadd.f32 %v325_v5, %v49_v58  ;;  %v73_v6 = vadd.f32 %v325_v5, %v50_v59  ;;  %v51_v8 = vmul.f32 %v318_v2, %v28_v60 }
  0x13   :  { %v116_v3 = vsel %vm84_vm8, %v68_v53, %v100_v62  ;;  %v117_v9 = vsel %vm85_vm9, %v69_v54, %v101_v63  ;;  %vm87_vm11 = vcmp.ge.f32.partialorder %v71_v0, 0.0  ;;  %v103_v10 = vmul.f32 0.2, %v71_v0 }
  0x14   :  { %v118_v11 = vsel %vm86_vm10, %v70_v57, %v102_v1  ;;  %v265_v12 = vpack.c.bf16 %v117_v9, %v116_v3  ;;  %vm88_vm12 = vcmp.ge.f32.partialorder %v72_v4, 0.0  ;;  %vm89_vm13 = vcmp.ge.f32.partialorder %v73_v6, 0.0 }
  0x15   :  { %v104_v13 = vmul.f32 0.2, %v72_v4  ;;  %v119_v14 = vsel %vm87_vm11, %v71_v0, %v103_v10  ;;  %v105_v15 = vmul.f32 0.2, %v73_v6  ;;  %v52_v16 = vmul.f32 %v318_v2, %v29_v7 }
  0x16   :  { %v74_v17 = vadd.f32 %v325_v5, %v51_v8  ;;  %285 = vst [vmem:[%s426_s3 + $0x20] sm:$0xff] %v265_v12   ;;  %v270_v18 = vpack.c.bf16 %v119_v14, %v118_v11 }
  0x17   :  { %v120_v19 = vsel %vm88_vm12, %v72_v4, %v104_v13  ;;  %v121_v20 = vsel %vm89_vm13, %v73_v6, %v105_v15  ;;  %v75_v21 = vadd.f32 %v325_v5, %v52_v16 }
  0x18   :  { %vm90_vm14 = vcmp.ge.f32.partialorder %v74_v17, 0.0  ;;  %v106_v22 = vmul.f32 0.2, %v74_v17  ;;  %286 = vst [vmem:[%s426_s3 + $0x28] sm:$0xff] %v270_v18   ;;  %v275_v23 = vpack.c.bf16 %v121_v20, %v120_v19 }
  0x19   :  { %vm91_vm15 = vcmp.ge.f32.partialorder %v75_v21, 0.0  ;;  %v107_v2 = vmul.f32 0.2, %v75_v21 }
  0x1a   :  { %v122_v24 = vsel %vm90_vm14, %v74_v17, %v106_v22  ;;  %287 = vst [vmem:[%s426_s3 + $0x30] sm:$0xff] %v275_v23  }
  0x1b   :  { %v123_v25 = vsel %vm91_vm15, %v75_v21, %v107_v2 }
  0x1c   :  { %v280_v26 = vpack.c.bf16 %v123_v25, %v122_v24 }
  0x1e   :  { %288 = vst [vmem:[%s426_s3 + $0x38] sm:$0xff] %v280_v26  }

// kernel: patch_discriminator_forward.11
= control target key start
LH: loop header
LB: loop body
LE: loop exit
PB: predicated region body
PF: predicated region fallthrough
CT: control target
= control target key end

     0   :  { %s638_s1 = inlined_call_operand.vmem [shape: bf16[128,128], index: 1, kind: input, shape index: {}]   ;;  %s639_s0 = inlined_call_operand.vmem [shape: bf16[128,128], index: 0, kind: input, shape index: {}]   ;;  %s640_s2 = inlined_call_operand.vmem [shape: f32[128,128], index: 2, kind: output, shape index: {0}]   ;;  %s641_s3 = inlined_call_operand.vmem [shape: f32[1,1,128], index: 3, kind: output, shape index: {1}]   ;;  %s642_s4 = inlined_call_operand.vmem [shape: f32[1,1,128], index: 4, kind: output, shape index: {2}]  }
   0x1   :  { %v495_v0 = vld [vmem:[%s638_s1] sm:$0xff]   ;;  %v496_v1 = vld [vmem:[%s638_s1 + $0x8] sm:$0xff]   ;;  %v497_v2 = vld [vmem:[%s638_s1 + $0x10] sm:$0xff]  }
   0x2   :  { %447 = vmatprep.subr.bf16.mxu0 %v495_v0  ;;  %479 = vmatprep.subr.bf16.mxu1 %v495_v0  ;;  %v498_v3 = vld [vmem:[%s638_s1 + $0x18] sm:$0xff]   ;;  %v503_v4 = vld [vmem:[%s639_s0] sm:$0xff]   ;;  %v500_v7 = vld [vmem:[%s638_s1 + $0x28] sm:$0xff]  }
   0x3   :  { %448 = vmatpush3.bf16.msra.mxu0 %v495_v0  ;;  %487 = vmatpush3.bf16.msra.mxu1 %v495_v0  ;;  %v499_v5 = vld [vmem:[%s638_s1 + $0x20] sm:$0xff]   ;;  %v501_v8 = vld [vmem:[%s638_s1 + $0x30] sm:$0xff]   ;;  %v502_v9 = vld [vmem:[%s638_s1 + $0x38] sm:$0xff]  }
   0x4   :  { %449 = vmatprep.subr.bf16.mxu0 %v496_v1  ;;  %480 = vmatprep.subr.bf16.mxu1 %v496_v1  ;;  %v507_v6 = vld [vmem:[%s639_s0 + $0x20] sm:$0xff]   ;;  %v504_v10 = vld [vmem:[%s639_s0 + $0x8] sm:$0xff]   ;;  %v505_v12 = vld [vmem:[%s639_s0 + $0x10] sm:$0xff]  }
   0x5   :  { %463 = vmatprep.mubr.bf16.mxu0 %v503_v4  ;;  %471 = vmatprep.mubr.bf16.mxu1 %v507_v6  ;;  %v508_v11 = vld [vmem:[%s639_s0 + $0x28] sm:$0xff]   ;;  %v509_v13 = vld [vmem:[%s639_s0 + $0x30] sm:$0xff]   ;;  %v506_v14 = vld [vmem:[%s639_s0 + $0x18] sm:$0xff]  }
   0x6   :  { %v510_v15 = vld [vmem:[%s639_s0 + $0x38] sm:$0xff]  }
   0x7   :  { %450 = vmatpush3.bf16.msra.mxu0 %v496_v1  ;;  %488 = vmatpush3.bf16.msra.mxu1 %v496_v1 }
   0x8   :  { %451 = vmatprep.subr.bf16.mxu0 %v497_v2  ;;  %481 = vmatprep.subr.bf16.mxu1 %v497_v2 }
   0xb   :  { %452 = vmatpush3.bf16.msra.mxu0 %v497_v2  ;;  %489 = vmatpush3.bf16.msra.mxu1 %v497_v2 }
   0xc   :  { %453 = vmatprep.subr.bf16.mxu0 %v498_v3  ;;  %482 = vmatprep.subr.bf16.mxu1 %v498_v3 }
   0xf   :  { %454 = vmatpush3.bf16.msra.mxu0 %v498_v3  ;;  %490 = vmatpush3.bf16.msra.mxu1 %v498_v3 }
  0x10   :  { %455 = vmatprep.subr.bf16.mxu0 %v499_v5  ;;  %483 = vmatprep.subr.bf16.mxu1 %v499_v5 }
  0x13   :  { %456 = vmatpush3.bf16.msra.mxu0 %v499_v5  ;;  %491 = vmatpush3.bf16.msra.mxu1 %v499_v5 }
  0x14   :  { %457 = vmatprep.subr.bf16.mxu0 %v500_v7  ;;  %484 = vmatprep.subr.bf16.mxu1 %v500_v7 }
  0x17   :  { %458 = vmatpush3.bf16.msra.mxu0 %v500_v7  ;;  %492 = vmatpush3.bf16.msra.mxu1 %v500_v7 }
  0x18   :  { %459 = vmatprep.subr.bf16.mxu0 %v501_v8  ;;  %485 = vmatprep.subr.bf16.mxu1 %v501_v8 }
  0x1b   :  { %460 = vmatpush3.bf16.msra.mxu0 %v501_v8  ;;  %493 = vmatpush3.bf16.msra.mxu1 %v501_v8 }
  0x1c   :  { %461 = vmatprep.subr.bf16.mxu0 %v502_v9  ;;  %486 = vmatprep.subr.bf16.mxu1 %v502_v9 }
  0x1f   :  { %462 = vmatpush3.bf16.msra.mxu0 %v502_v9  ;;  %494 = vmatpush3.bf16.msra.mxu1 %v502_v9 }
  0x22   :  { %464 = vmatmul.mubr.bf16.vlgmr.msra.gmra.mrb[0].mxu0 %v504_v10  ;;  %472 = vmatmul.mubr.bf16.vlgmr.msra.gmra.mrb[0].mxu1 %v508_v11 }
  0x23   :  { %467 = vmatprep.mubr.bf16.mxu0 %v505_v12  ;;  %475 = vmatprep.mubr.bf16.mxu1 %v509_v13 }
  0x2a   :  { %468 = vmatmul.mubr.bf16.gmra.mrb[4].mxu0 %v506_v14  ;;  %476 = vmatmul.mubr.bf16.gmra.mrb[4].mxu1 %v510_v15 }
  0xf5   :  { %v465_v16 = vpop.f32.mrb[0].mxu0  ;;  %v473_v17 = vpop.f32.mrb[0].mxu1 }
  0xf6   :  { %329 = vst [vmem:[%s640_s2 + $0x10] sm:$0xff] %v465_v16  ;;  %v213_v18 = vpop.f32.mrb[1].mxu0  ;;  %337 = vst [vmem:[%s640_s2 + $0x50] sm:$0xff] %v473_v17  ;;  %v245_v19 = vpop.f32.mrb[1].mxu1  ;;  %v367_v27 = vmul.f32 %v465_v16, %v465_v16  ;;  %v375_v59 = vmul.f32 %v473_v17, %v473_v17 }
  0xf7   :  { %327 = vst [vmem:[%s640_s2] sm:$0xff] %v213_v18  ;;  %v466_v20 = vpop.f32.mrb[2].mxu0  ;;  %335 = vst [vmem:[%s640_s2 + $0x40] sm:$0xff] %v245_v19  ;;  %v474_v21 = vpop.f32.mrb[2].mxu1  ;;  %v365_v24 = vmul.f32 %v213_v18, %v213_v18  ;;  %v373_v53 = vmul.f32 %v245_v19, %v245_v19 }
  0xf8   :  { %330 = vst [vmem:[%s640_s2 + $0x18] sm:$0xff] %v466_v20  ;;  %v216_v22 = vpop.f32.mrb[3].mxu0  ;;  %338 = vst [vmem:[%s640_s2 + $0x58] sm:$0xff] %v474_v21  ;;  %v248_v23 = vpop.f32.mrb[3].mxu1  ;;  %v368_v30 = vmul.f32 %v466_v20, %v466_v20  ;;  %v376_v62 = vmul.f32 %v474_v21, %v474_v21 }
  0xf9   :  { %328 = vst [vmem:[%s640_s2 + $0x8] sm:$0xff] %v216_v22  ;;  %v343_v25 = vadd.f32 %v216_v22, %v213_v18  ;;  %v366_v26 = vmul.f32 %v216_v22, %v216_v22  ;;  %336 = vst [vmem:[%s640_s2 + $0x48] sm:$0xff] %v248_v23  ;;  %v374_v58 = vmul.f32 %v248_v23, %v248_v23 }
  0xfb   :  { %v344_v28 = vadd.f32 %v465_v16, %v343_v25  ;;  %v381_v29 = vadd.f32 %v366_v26, %v365_v24 }
  0xfd   :  { %v382_v31 = vadd.f32 %v381_v29, %v367_v27  ;;  %v469_v32 = vpop.f32.mrb[4].mxu0  ;;  %v345_v33 = vadd.f32 %v466_v20, %v344_v28  ;;  %v477_v34 = vpop.f32.mrb[4].mxu1 }
  0xfe   :  { %333 = vst [vmem:[%s640_s2 + $0x30] sm:$0xff] %v469_v32  ;;  %v229_v35 = vpop.f32.mrb[5].mxu0  ;;  %341 = vst [vmem:[%s640_s2 + $0x70] sm:$0xff] %v477_v34  ;;  %v261_v36 = vpop.f32.mrb[5].mxu1  ;;  %v371_v47 = vmul.f32 %v469_v32, %v469_v32  ;;  %v379_v7 = vmul.f32 %v477_v34, %v477_v34 }
  0xff   :  { %331 = vst [vmem:[%s640_s2 + $0x20] sm:$0xff] %v229_v35  ;;  %v346_v37 = vadd.f32 %v345_v33, %v229_v35  ;;  %v369_v38 = vmul.f32 %v229_v35, %v229_v35  ;;  %v383_v39 = vadd.f32 %v382_v31, %v368_v30  ;;  %v470_v40 = vpop.f32.mrb[6].mxu0  ;;  %339 = vst [vmem:[%s640_s2 + $0x60] sm:$0xff] %v261_v36  ;;  %v478_v41 = vpop.f32.mrb[6].mxu1 }
 0x100   :  { %334 = vst [vmem:[%s640_s2 + $0x38] sm:$0xff] %v470_v40  ;;  %v232_v42 = vpop.f32.mrb[7].mxu0  ;;  %342 = vst [vmem:[%s640_s2 + $0x78] sm:$0xff] %v478_v41  ;;  %v264_v43 = vpop.f32.mrb[7].mxu1  ;;  %v372_v50 = vmul.f32 %v470_v40, %v470_v40  ;;  %v377_v1 = vmul.f32 %v261_v36, %v261_v36  ;;  %v380_v10 = vmul.f32 %v478_v41, %v478_v41 }
 0x101   :  { %v384_v44 = vadd.f32 %v383_v39, %v369_v38  ;;  %332 = vst [vmem:[%s640_s2 + $0x28] sm:$0xff] %v232_v42  ;;  %v347_v45 = vadd.f32 %v346_v37, %v232_v42  ;;  %v370_v46 = vmul.f32 %v232_v42, %v232_v42  ;;  %340 = vst [vmem:[%s640_s2 + $0x68] sm:$0xff] %v264_v43 }
 0x102   :  { %v378_v6 = vmul.f32 %v264_v43, %v264_v43 }
 0x103   :  { %v348_v48 = vadd.f32 %v469_v32, %v347_v45  ;;  %v385_v49 = vadd.f32 %v384_v44, %v370_v46 }
 0x105   :  { %v386_v51 = vadd.f32 %v385_v49, %v371_v47  ;;  %v349_v52 = vadd.f32 %v470_v40, %v348_v48 }
 0x107   :  { %v350_v54 = vadd.f32 %v349_v52, %v245_v19  ;;  %v387_v55 = vadd.f32 %v386_v51, %v372_v50 }
 0x109   :  { %v388_v56 = vadd.f32 %v387_v55, %v373_v53  ;;  %v351_v57 = vadd.f32 %v350_v54, %v248_v23 }
 0x10b   :  { %v352_v60 = vadd.f32 %v473_v17, %v351_v57  ;;  %v389_v61 = vadd.f32 %v388_v56, %v374_v58 }
 0x10d   :  { %v390_v63 = vadd.f32 %v389_v61, %v375_v59  ;;  %v353_v0 = vadd.f32 %v474_v21, %v352_v60 }
 0x10f   :  { %v354_v2 = vadd.f32 %v353_v0, %v261_v36  ;;  %v391_v3 = vadd.f32 %v390_v63, %v376_v62 }
 0x111   :  { %v392_v4 = vadd.f32 %v391_v3, %v377_v1  ;;  %v355_v5 = vadd.f32 %v354_v2, %v264_v43 }
 0x113   :  { %v356_v8 = vadd.f32 %v477_v34, %v355_v5  ;;  %v393_v9 = vadd.f32 %v392_v4, %v378_v6 }
 0x115   :  { %v357_v11 = vadd.f32 %v478_v41, %v356_v8  ;;  %v394_v12 = vadd.f32 %v393_v9, %v379_v7 }
 0x117   :  { %v358_v13 = vrot.slane %v357_v11, 4  ;;  %v395_v14 = vadd.f32 %v394_v12, %v380_v10 }
 0x119   :  { %v359_v15 = vadd.f32 %v358_v13, %v357_v11  ;;  %v396_v16 = vrot.slane %v395_v14, 4 }
 0x11b   :  { %v360_v17 = vrot.slane %v359_v15, 2  ;;  %v397_v18 = vadd.f32 %v396_v16, %v395_v14 }
 0x11d   :  { %v361_v19 = vadd.f32 %v360_v17, %v359_v15  ;;  %v398_v20 = vrot.slane %v397_v18, 2 }
 0x11f   :  { %v362_v21 = vrot.slane %v361_v19, 1  ;;  %v399_v22 = vadd.f32 %v398_v20, %v397_v18 }
 0x121   :  { %v363_v23 = vadd.f32 %v362_v21, %v361_v19  ;;  %v400_v24 = vrot.slane %v399_v22, 1 }
 0x123   :  { %364 = vst [vmem:[%s641_s3] sm:$0x1] %v363_v23  ;;  %v401_v25 = vadd.f32 %v400_v24, %v399_v22 }
 0x125   :  { %402 = vst [vmem:[%s642_s4] sm:$0x1] %v401_v25 }

// kernel: patch_discriminator_forward.13
= control target key start
LH: loop header
LB: loop body
LE: loop exit
PB: predicated region body
PF: predicated region fallthrough
CT: control target
= control target key end

     0   :  { %s472_s1 = inlined_call_operand.vmem [shape: bf16[256,128], index: 1, kind: input, shape index: {}]   ;;  %s473_s0 = inlined_call_operand.vmem [shape: bf16[32,256], index: 0, kind: input, shape index: {}]   ;;  %s474_s2 = inlined_call_operand.vmem [shape: f32[32,128], index: 2, kind: output, shape index: {0}]   ;;  %s475_s3 = inlined_call_operand.vmem [shape: f32[1,1,128], index: 3, kind: output, shape index: {1}]   ;;  %s476_s4 = inlined_call_operand.vmem [shape: f32[1,1,128], index: 4, kind: output, shape index: {2}]  }
   0x1   :  { %v347_v0 = vld [vmem:[%s472_s1 + $0x40] sm:$0xff]   ;;  %v349_v2 = vld [vmem:[%s472_s1 + $0x48] sm:$0xff]   ;;  %v351_v4 = vld [vmem:[%s472_s1 + $0x50] sm:$0xff]  }
   0x2   :  { %v348_v1 = vld [vmem:[%s472_s1] sm:$0xff]   ;;  %303 = vmatprep.subr.bf16.mxu0 %v347_v0  ;;  %331 = vmatprep.subr.bf16.mxu1 %v347_v0  ;;  %v350_v3 = vld [vmem:[%s472_s1 + $0x8] sm:$0xff]   ;;  %v352_v5 = vld [vmem:[%s472_s1 + $0x10] sm:$0xff]  }
   0x3   :  { %304 = vmatpush3.bf16.msra.mxu0 %v348_v1  ;;  %339 = vmatpush3.bf16.msra.mxu1 %v348_v1  ;;  %v353_v6 = vld [vmem:[%s472_s1 + $0x58] sm:$0xff]   ;;  %v355_v8 = vld [vmem:[%s472_s1 + $0x60] sm:$0xff]   ;;  %v357_v10 = vld [vmem:[%s472_s1 + $0x68] sm:$0xff]  }
   0x4   :  { %305 = vmatprep.subr.bf16.mxu0 %v349_v2  ;;  %332 = vmatprep.subr.bf16.mxu1 %v349_v2  ;;  %v354_v7 = vld [vmem:[%s472_s1 + $0x18] sm:$0xff]   ;;  %v356_v9 = vld [vmem:[%s472_s1 + $0x20] sm:$0xff]   ;;  %v358_v13 = vld [vmem:[%s472_s1 + $0x28] sm:$0xff]  }
   0x5   :  { %v365_v11 = vld [vmem:[%s473_s0 + $0x4] ss:$8 sps:$4 sm:$0xff]   ;;  %v368_v12 = vld [vmem:[%s473_s0 + $0x14] ss:$8 sps:$4 sm:$0xff]   ;;  %v363_v18 = vld [vmem:[%s473_s0] ss:$8 sps:$4 sm:$0xff]  }
   0x6   :  { %v359_v14 = vld [vmem:[%s472_s1 + $0x70] sm:$0xff]   ;;  %211 = vmatprep.mubr.bf16.mxu0 %v365_v11  ;;  %219 = vmatprep.mubr.bf16.mxu1 %v368_v12  ;;  %v361_v16 = vld [vmem:[%s472_s1 + $0x78] sm:$0xff]  }
   0x7   :  { %306 = vmatpush3.bf16.msra.mxu0 %v350_v3  ;;  %340 = vmatpush3.bf16.msra.mxu1 %v350_v3  ;;  %v360_v15 = vld [vmem:[%s472_s1 + $0x30] sm:$0xff]   ;;  %v362_v17 = vld [vmem:[%s472_s1 + $0x38] sm:$0xff]  }
   0x8   :  { %307 = vmatprep.subr.bf16.mxu0 %v351_v4  ;;  %333 = vmatprep.subr.bf16.mxu1 %v351_v4  ;;  %v366_v19 = vld [vmem:[%s473_s0 + $0x10] ss:$8 sps:$4 sm:$0xff]  }
   0xb   :  { %308 = vmatpush3.bf16.msra.mxu0 %v352_v5  ;;  %341 = vmatpush3.bf16.msra.mxu1 %v352_v5 }
   0xc   :  { %309 = vmatprep.subr.bf16.mxu0 %v353_v6  ;;  %334 = vmatprep.subr.bf16.mxu1 %v353_v6 }
   0xf   :  { %310 = vmatpush3.bf16.msra.mxu0 %v354_v7  ;;  %342 = vmatpush3.bf16.msra.mxu1 %v354_v7 }
  0x10   :  { %311 = vmatprep.subr.bf16.mxu0 %v355_v8  ;;  %335 = vmatprep.subr.bf16.mxu1 %v355_v8 }
  0x13   :  { %312 = vmatpush3.bf16.msra.mxu0 %v356_v9  ;;  %343 = vmatpush3.bf16.msra.mxu1 %v356_v9 }
  0x14   :  { %313 = vmatprep.subr.bf16.mxu0 %v357_v10  ;;  %336 = vmatprep.subr.bf16.mxu1 %v357_v10 }
  0x17   :  { %314 = vmatpush3.bf16.msra.mxu0 %v358_v13  ;;  %344 = vmatpush3.bf16.msra.mxu1 %v358_v13 }
  0x18   :  { %315 = vmatprep.subr.bf16.mxu0 %v359_v14  ;;  %337 = vmatprep.subr.bf16.mxu1 %v359_v14 }
  0x1b   :  { %316 = vmatpush3.bf16.msra.mxu0 %v360_v15  ;;  %345 = vmatpush3.bf16.msra.mxu1 %v360_v15 }
  0x1c   :  { %317 = vmatprep.subr.bf16.mxu0 %v361_v16  ;;  %338 = vmatprep.subr.bf16.mxu1 %v361_v16 }
  0x1f   :  { %318 = vmatpush3.bf16.msra.mxu0 %v362_v17  ;;  %346 = vmatpush3.bf16.msra.mxu1 %v362_v17 }
  0x22   :  { %212 = vmatmul.mubr.bf16.vlgmr.msra.gmra.mrb[0].mxu0 %v363_v18  ;;  %220 = vmatmul.mubr.bf16.vlgmr.msra.gmra.mrb[0].mxu1 %v366_v19 }
  0xf5   :  { %v319_v20 = vpop.f32.mrb[0].mxu0  ;;  %v325_v21 = vpop.f32.mrb[0].mxu1 }
  0xf6   :  { %v320_v22 = vpop.f32.mrb[1].mxu0  ;;  %v326_v23 = vpop.f32.mrb[1].mxu1 }
  0xf7   :  { %v321_v24 = vadd.f32 %v320_v22, %v319_v20  ;;  %v322_v25 = vpop.f32.mrb[2].mxu0  ;;  %v327_v26 = vadd.f32 %v326_v23, %v325_v21  ;;  %v328_v27 = vpop.f32.mrb[2].mxu1 }
  0xf8   :  { %v323_v28 = vpop.f32.mrb[3].mxu0  ;;  %v329_v29 = vpop.f32.mrb[3].mxu1 }
  0xf9   :  { %243 = vst [vmem:[%s474_s2] sm:$0xff] %v321_v24  ;;  %245 = vst [vmem:[%s474_s2 + $0x10] sm:$0xff] %v327_v26  ;;  %v324_v30 = vadd.f32 %v323_v28, %v322_v25  ;;  %v330_v31 = vadd.f32 %v329_v29, %v328_v27  ;;  %v257_v32 = vmul.f32 %v321_v24, %v321_v24 }
  0xfa   :  { %v259_v33 = vmul.f32 %v327_v26, %v327_v26 }
  0xfb   :  { %244 = vst [vmem:[%s474_s2 + $0x8] sm:$0xff] %v324_v30  ;;  %v247_v34 = vadd.f32 %v324_v30, %v321_v24  ;;  %v258_v35 = vmul.f32 %v324_v30, %v324_v30  ;;  %246 = vst [vmem:[%s474_s2 + $0x18] sm:$0xff] %v330_v31  ;;  %v260_v39 = vmul.f32 %v330_v31, %v330_v31 }
  0xfd   :  { %v261_v36 = vadd.f32 %v258_v35, %v257_v32  ;;  %v248_v37 = vadd.f32 %v327_v26, %v247_v34 }
  0xff   :  { %v249_v38 = vadd.f32 %v330_v31, %v248_v37  ;;  %v262_v40 = vadd.f32 %v261_v36, %v259_v33 }
 0x101   :  { %v250_v41 = vrot.slane %v249_v38, 4  ;;  %v263_v42 = vadd.f32 %v262_v40, %v260_v39 }
 0x103   :  { %v251_v43 = vadd.f32 %v250_v41, %v249_v38  ;;  %v264_v44 = vrot.slane %v263_v42, 4 }
 0x105   :  { %v252_v45 = vrot.slane %v251_v43, 2  ;;  %v265_v46 = vadd.f32 %v264_v44, %v263_v42 }
 0x107   :  { %v253_v47 = vadd.f32 %v252_v45, %v251_v43  ;;  %v266_v48 = vrot.slane %v265_v46, 2 }
 0x109   :  { %v254_v49 = vrot.slane %v253_v47, 1  ;;  %v267_v50 = vadd.f32 %v266_v48, %v265_v46 }
 0x10b   :  { %v255_v51 = vadd.f32 %v254_v49, %v253_v47  ;;  %v268_v52 = vrot.slane %v267_v50, 1 }
 0x10d   :  { %256 = vst [vmem:[%s475_s3] sm:$0x1] %v255_v51  ;;  %v269_v53 = vadd.f32 %v268_v52, %v267_v50 }
 0x10f   :  { %270 = vst [vmem:[%s476_s4] sm:$0x1] %v269_v53 }

// kernel: patch_discriminator_forward.14
= control target key start
LH: loop header
LB: loop body
LE: loop exit
PB: predicated region body
PF: predicated region fallthrough
CT: control target
= control target key end

     0   :  { %s141_s0 = inlined_call_operand.vmem [shape: f32[32,128], index: 0, kind: input, shape index: {}]   ;;  %s142_s1 = inlined_call_operand.vmem [shape: f32[1,128], index: 1, kind: input, shape index: {}]   ;;  %s143_s2 = inlined_call_operand.vmem [shape: f32[1,128], index: 2, kind: input, shape index: {}]   ;;  %s144_s3 = inlined_call_operand.vmem [shape: bf16[32,128], index: 3, kind: output, shape index: {}]  }
   0x1   :  { %v14_v0 = vld [vmem:[%s141_s0] sm:$0xff]  ;;  %v15_v1 = vld [vmem:[%s141_s0 + $0x8] sm:$0xff]  ;;  %v16_v6 = vld [vmem:[%s141_s0 + $0x10] sm:$0xff] }
   0x2   :  { %v76_v2 = vld [vmem:[%s142_s1] ss:$0 sm:$0xff]  ;;  %v17_v7 = vld [vmem:[%s141_s0 + $0x18] sm:$0xff] }
   0x3   :  { %v25_v3 = vmul.f32 %v76_v2, %v14_v0  ;;  %v26_v4 = vmul.f32 %v76_v2, %v15_v1  ;;  %v77_v5 = vld [vmem:[%s143_s2] ss:$0 sm:$0xff]  ;;  %v27_v8 = vmul.f32 %v76_v2, %v16_v6  ;;  %v28_v9 = vmul.f32 %v76_v2, %v17_v7 }
   0x5   :  { %v36_v10 = vadd.f32 %v77_v5, %v25_v3  ;;  %v37_v11 = vadd.f32 %v77_v5, %v26_v4  ;;  %v38_v12 = vadd.f32 %v77_v5, %v27_v8  ;;  %v39_v13 = vadd.f32 %v77_v5, %v28_v9 }
   0x7   :  { %vm40_vm0 = vcmp.ge.f32.partialorder %v36_v10, 0.0  ;;  %vm41_vm1 = vcmp.ge.f32.partialorder %v37_v11, 0.0  ;;  %v44_v14 = vmul.f32 0.2, %v36_v10  ;;  %v45_v15 = vmul.f32 0.2, %v37_v11 }
   0x8   :  { %vm42_vm2 = vcmp.ge.f32.partialorder %v38_v12, 0.0  ;;  %vm43_vm3 = vcmp.ge.f32.partialorder %v39_v13, 0.0  ;;  %v46_v16 = vmul.f32 0.2, %v38_v12  ;;  %v47_v17 = vmul.f32 0.2, %v39_v13 }
   0x9   :  { %v48_v18 = vsel %vm40_vm0, %v36_v10, %v44_v14  ;;  %v49_v19 = vsel %vm41_vm1, %v37_v11, %v45_v15 }
   0xa   :  { %v89_v20 = vpack.c.bf16 %v49_v19, %v48_v18  ;;  %v50_v21 = vsel %vm42_vm2, %v38_v12, %v46_v16  ;;  %v51_v22 = vsel %vm43_vm3, %v39_v13, %v47_v17 }
   0xb   :  { %v94_v23 = vpack.c.bf16 %v51_v22, %v50_v21 }
   0xc   :  { %90 = vst [vmem:[%s144_s3] sm:$0xff] %v89_v20  }
   0xd   :  { %96 = vst [vmem:[%s144_s3 + $0x8] sm:$0xff] %v94_v23  }

// kernel: patch_discriminator_forward.16
= control target key start
LH: loop header
LB: loop body
LE: loop exit
PB: predicated region body
PF: predicated region fallthrough
CT: control target
= control target key end

     0   :  { %s71_s0 = inlined_call_operand.vmem [shape: f32[8,128], index: 0, kind: input, shape index: {}]   ;;  %s72_s1 = inlined_call_operand.vmem [shape: f32[1,128], index: 1, kind: input, shape index: {}]   ;;  %s73_s2 = inlined_call_operand.vmem [shape: f32[1,128], index: 2, kind: input, shape index: {}]   ;;  %s74_s3 = inlined_call_operand.vmem [shape: bf16[8,128], index: 3, kind: output, shape index: {}]  }
   0x1   :  { %v14_v0 = vld [vmem:[%s71_s0] sm:$0xff] }
   0x2   :  { %v37_v1 = vld [vmem:[%s72_s1] ss:$0 sm:$0xff] }
   0x3   :  { %v38_v2 = vld [vmem:[%s73_s2] ss:$0 sm:$0xff]  ;;  %v22_v3 = vmul.f32 %v37_v1, %v14_v0 }
   0x5   :  { %v30_v4 = vadd.f32 %v38_v2, %v22_v3 }
   0x7   :  { %v31_v5 = vpack.c.bf16 %v30_v4, %v30_v4 }
   0x9   :  { %32 = vst [vmem:[%s74_s3] sm:$0xf] %v31_v5 }

// kernel: patch_discriminator_forward.15
= control target key start
LH: loop header
LB: loop body
LE: loop exit
PB: predicated region body
PF: predicated region fallthrough
CT: control target
= control target key end

     0   :  { %s659_s1 = inlined_call_operand.vmem [shape: bf16[512,128], index: 1, kind: input, shape index: {}]   ;;  %s660_s0 = inlined_call_operand.vmem [shape: bf16[8,512], index: 0, kind: input, shape index: {}]   ;;  %s661_s2 = inlined_call_operand.vmem [shape: f32[8,128], index: 2, kind: output, shape index: {0}]   ;;  %s662_s3 = inlined_call_operand.vmem [shape: f32[1,1,128], index: 3, kind: output, shape index: {1}]   ;;  %s663_s4 = inlined_call_operand.vmem [shape: f32[1,1,128], index: 4, kind: output, shape index: {2}]  }
   0x1   :  { %v487_v0 = vld [vmem:[%s659_s1 + $0x40] sm:$0xff]   ;;  %v491_v4 = vld [vmem:[%s659_s1 + $0x48] sm:$0xff]   ;;  %v495_v8 = vld [vmem:[%s659_s1 + $0x50] sm:$0xff]  }
   0x2   :  { %v488_v1 = vld [vmem:[%s659_s1 + $0xc0] sm:$0xff]   ;;  %443 = vmatprep.subr.bf16.mxu0 %v487_v0  ;;  %v492_v5 = vld [vmem:[%s659_s1 + $0xc8] sm:$0xff]   ;;  %v496_v9 = vld [vmem:[%s659_s1 + $0xd0] sm:$0xff]  }
   0x3   :  { %v489_v2 = vld [vmem:[%s659_s1] sm:$0xff]   ;;  %465 = vmatprep.subr.bf16.mxu1 %v488_v1  ;;  %v493_v6 = vld [vmem:[%s659_s1 + $0x8] sm:$0xff]   ;;  %v497_v10 = vld [vmem:[%s659_s1 + $0x10] sm:$0xff]  }
   0x4   :  { %v490_v3 = vld [vmem:[%s659_s1 + $0x80] sm:$0xff]   ;;  %444 = vmatpush3.bf16.msra.mxu0 %v489_v2  ;;  %v494_v7 = vld [vmem:[%s659_s1 + $0x88] sm:$0xff]   ;;  %v498_v11 = vld [vmem:[%s659_s1 + $0x90] sm:$0xff]  }
   0x5   :  { %466 = vmatpush3.bf16.msra.mxu1 %v490_v3  ;;  %445 = vmatprep.subr.bf16.mxu0 %v491_v4  ;;  %v499_v12 = vld [vmem:[%s659_s1 + $0x58] sm:$0xff]   ;;  %v503_v16 = vld [vmem:[%s659_s1 + $0x60] sm:$0xff]   ;;  %v507_v20 = vld [vmem:[%s659_s1 + $0x68] sm:$0xff]  }
   0x6   :  { %467 = vmatprep.subr.bf16.mxu1 %v492_v5  ;;  %v500_v13 = vld [vmem:[%s659_s1 + $0xd8] sm:$0xff]   ;;  %v504_v17 = vld [vmem:[%s659_s1 + $0xe0] sm:$0xff]   ;;  %v508_v21 = vld [vmem:[%s659_s1 + $0xe8] sm:$0xff]  }
   0x7   :  { %v501_v14 = vld [vmem:[%s659_s1 + $0x18] sm:$0xff]   ;;  %v505_v18 = vld [vmem:[%s659_s1 + $0x20] sm:$0xff]   ;;  %v509_v22 = vld [vmem:[%s659_s1 + $0x28] sm:$0xff]  }
   0x8   :  { %446 = vmatpush3.bf16.msra.mxu0 %v493_v6  ;;  %v502_v15 = vld [vmem:[%s659_s1 + $0x98] sm:$0xff]   ;;  %v506_v19 = vld [vmem:[%s659_s1 + $0xa0] sm:$0xff]   ;;  %v510_v23 = vld [vmem:[%s659_s1 + $0xa8] sm:$0xff]  }
   0x9   :  { %468 = vmatpush3.bf16.msra.mxu1 %v494_v7  ;;  %447 = vmatprep.subr.bf16.mxu0 %v495_v8  ;;  %v511_v24 = vld [vmem:[%s659_s1 + $0x70] sm:$0xff]   ;;  %v515_v28 = vld [vmem:[%s659_s1 + $0x78] sm:$0xff]   ;;  %v21_v32 = vld [vmem:[%s660_s0] sm:$0xff] }
   0xa   :  { %469 = vmatprep.subr.bf16.mxu1 %v496_v9  ;;  %v512_v25 = vld [vmem:[%s659_s1 + $0xf0] sm:$0xff]   ;;  %v516_v29 = vld [vmem:[%s659_s1 + $0xf8] sm:$0xff]   ;;  %v22_v33 = vld [vmem:[%s660_s0 + $0x8] sm:$0xff]  ;;  %v407_v34 = vcombine.low %v21_v32, %v21_v32  ;;  %v408_v35 = vcombine.high %v21_v32, %v21_v32 }
   0xb   :  { %v513_v26 = vld [vmem:[%s659_s1 + $0x30] sm:$0xff]   ;;  %v517_v30 = vld [vmem:[%s659_s1 + $0x38] sm:$0xff]   ;;  %v409_v36 = vcombine.low %v22_v33, %v22_v33  ;;  %v410_v37 = vcombine.high %v22_v33, %v22_v33 }
   0xc   :  { %448 = vmatpush3.bf16.msra.mxu0 %v497_v10  ;;  %v514_v27 = vld [vmem:[%s659_s1 + $0xb0] sm:$0xff]   ;;  %v518_v31 = vld [vmem:[%s659_s1 + $0xb8] sm:$0xff]   ;;  %325 = vmatprep.mubr.bf16.mxu0 %v408_v35 }
   0xd   :  { %470 = vmatpush3.bf16.msra.mxu1 %v498_v11  ;;  %449 = vmatprep.subr.bf16.mxu0 %v499_v12 }
   0xe   :  { %471 = vmatprep.subr.bf16.mxu1 %v500_v13  ;;  %365 = vmatprep.mubr.bf16.mxu1 %v410_v37 }
  0x10   :  { %450 = vmatpush3.bf16.msra.mxu0 %v501_v14 }
  0x11   :  { %472 = vmatpush3.bf16.msra.mxu1 %v502_v15  ;;  %451 = vmatprep.subr.bf16.mxu0 %v503_v16 }
  0x12   :  { %473 = vmatprep.subr.bf16.mxu1 %v504_v17 }
  0x14   :  { %452 = vmatpush3.bf16.msra.mxu0 %v505_v18 }
  0x15   :  { %474 = vmatpush3.bf16.msra.mxu1 %v506_v19  ;;  %453 = vmatprep.subr.bf16.mxu0 %v507_v20 }
  0x16   :  { %475 = vmatprep.subr.bf16.mxu1 %v508_v21 }
  0x18   :  { %454 = vmatpush3.bf16.msra.mxu0 %v509_v22 }
  0x19   :  { %476 = vmatpush3.bf16.msra.mxu1 %v510_v23  ;;  %455 = vmatprep.subr.bf16.mxu0 %v511_v24 }
  0x1a   :  { %477 = vmatprep.subr.bf16.mxu1 %v512_v25 }
  0x1c   :  { %456 = vmatpush3.bf16.msra.mxu0 %v513_v26 }
  0x1d   :  { %478 = vmatpush3.bf16.msra.mxu1 %v514_v27  ;;  %457 = vmatprep.subr.bf16.mxu0 %v515_v28 }
  0x1e   :  { %479 = vmatprep.subr.bf16.mxu1 %v516_v29 }
  0x20   :  { %458 = vmatpush3.bf16.msra.mxu0 %v517_v30 }
  0x21   :  { %480 = vmatpush3.bf16.msra.mxu1 %v518_v31 }
  0x23   :  { %326 = vmatmul.mubr.bf16.vlgmr.msra.gmra.mrb[0].mxu0 %v407_v34 }
  0x24   :  { %366 = vmatmul.mubr.bf16.vlgmr.msra.gmra.mrb[0].mxu1 %v409_v36 }
  0xf6   :  { %v459_v38 = vpop.f32.mrb[0].mxu0 }
  0xf7   :  { %v481_v39 = vpop.f32.mrb[0].mxu1  ;;  %v460_v40 = vpop.f32.mrb[1].mxu0 }
  0xf8   :  { %v482_v41 = vpop.f32.mrb[1].mxu1  ;;  %v461_v42 = vadd.f32 %v460_v40, %v459_v38  ;;  %v462_v44 = vpop.f32.mrb[2].mxu0 }
  0xf9   :  { %v483_v43 = vadd.f32 %v482_v41, %v481_v39  ;;  %v484_v45 = vpop.f32.mrb[2].mxu1  ;;  %v463_v46 = vpop.f32.mrb[3].mxu0 }
  0xfa   :  { %v485_v47 = vpop.f32.mrb[3].mxu1 }
  0xfb   :  { %v368_v48 = vadd.f32 %v483_v43, %v461_v42 }
  0xfd   :  { %379 = vst [vmem:[%s661_s2] sm:$0xff] %v368_v48  ;;  %v380_v49 = vrot.slane %v368_v48, 4  ;;  %v387_v50 = vmul.f32 %v368_v48, %v368_v48 }
  0xff   :  { %v381_v51 = vadd.f32 %v380_v49, %v368_v48  ;;  %v388_v52 = vrot.slane %v387_v50, 4 }
 0x101   :  { %v382_v53 = vrot.slane %v381_v51, 2  ;;  %v389_v54 = vadd.f32 %v388_v52, %v387_v50 }
 0x103   :  { %v383_v55 = vadd.f32 %v382_v53, %v381_v51  ;;  %v390_v56 = vrot.slane %v389_v54, 2 }
 0x105   :  { %v384_v57 = vrot.slane %v383_v55, 1  ;;  %v391_v58 = vadd.f32 %v390_v56, %v389_v54 }
 0x107   :  { %v385_v59 = vadd.f32 %v384_v57, %v383_v55  ;;  %v392_v60 = vrot.slane %v391_v58, 1 }
 0x109   :  { %386 = vst [vmem:[%s662_s3] sm:$0x1] %v385_v59  ;;  %v393_v61 = vadd.f32 %v392_v60, %v391_v58 }
 0x10b   :  { %394 = vst [vmem:[%s663_s4] sm:$0x1] %v393_v61 }

// kernel: patch_discriminator_forward.17
= control target key start
LH: loop header
LB: loop body
LE: loop exit
PB: predicated region body
PF: predicated region fallthrough
CT: control target
= control target key end

     0   :  { %s871_s12 = smov 0   ;;  %s873_s13 = smov 0   ;;  %s954_s0 = inlined_call_operand.vmem [shape: bf16[8,1024], index: 0, kind: input, shape index: {}]   ;;  %s955_s1 = inlined_call_operand.vmem [shape: bf16[1024,128], index: 1, kind: input, shape index: {}]   ;;  %s956_s2 = inlined_call_operand.vmem [shape: f32[1,128], index: 2, kind: input, shape index: {}]   ;;  %s957_s3 = inlined_call_operand.vmem [shape: f32[8,128], index: 3, kind: output, shape index: {}]  }
   0x1   :  { %s875_s14 = smov 0  }
   0x2 LB: > { %s22_s15 = sadd.s32 1, %s844_s13  ;;  %p674_p0 = scmp.ge.s32.totalorder %s848_s14, 1  ;;  %s848_s14 = sphi %s875_s14, %s13_s14   ;;  %s844_s13 = sphi %s873_s13, %s959_s13   ;;  %s840_s12 = sphi %s871_s12, %s958_s12  }
   0x3   : > { %p23_p1 = scmp.ge.s32.totalorder %s22_s15, 2  ;;  %p167_p2 = scmp.lt.s32.totalorder %s848_s14, 3 }
   0x5   : > { %s961_s15 = smov (%p23_p1, %s22_s15), 0  ;;  %p168_p3 = pnand %p674_p0, %p167_p2 }
   0x6   : > { %s675_s16 = sshll.u32 (!%p168_p3), %s840_s12, 2  ;;  %s677_s17 = sshll.u32 (!%p168_p3), %s840_s12, 6 }
   0x7   : > { %171 = sbr.rel (%p168_p3) target bundleno = 289 (0x121), region = 32  ;;  %p202_p4 = scmp.lt.s32.totalorder (!%p168_p3), %s675_s16, 7 }
   0x8   : > { %p210_p5 = scmp.lt.s32.totalorder (!%p168_p3), %s677_s17, 127  ;;  %p679_p6 = scmp.ne.s32.totalorder (!%p168_p3), %s840_s12, 0 }
   0xe   : > { %s963_s16 = smov (!%p202_p4, %s675_s16), 7  ;;  %s965_s17 = smov (!%p210_p5, %s677_s17), 127 }
   0xf   : > { %s676_s18 = sshll.u32 %s963_s16, 2  ;;  %s678_s22 = sshll.u32 %s965_s17, 2  ;;  %v850_v0 = vmov (!%p679_p6), 0.0  }
  0x10   : > { %s896_s21 = scalar_lea.vmem %s954_s0, %s676_s18  ;;  %s901_s25 = scalar_lea.vmem %s955_s1, %s678_s22  ;;  %224 = vst [vmem:[#allocation2] sm:$0xff] (!%p679_p6), %v850_v0 }
  0x11   : > { %223 = sbr.rel (%p679_p6) target bundleno = 24 (0x18), region = 36 }
  0x18 PF: > { %v790_v1 = vld [vmem:[%s901_s25 + $0x40] sm:$0xff]   ;;  %v794_v5 = vld [vmem:[%s901_s25 + $0x48] sm:$0xff]   ;;  %v798_v9 = vld [vmem:[%s901_s25 + $0x50] sm:$0xff]   ;;  %p716_p7 = scmp.ne.s32.totalorder %s840_s12, 1 }
  0x19   : > { %v791_v2 = vld [vmem:[%s901_s25 + $0xc0] sm:$0xff]   ;;  %721 = vmatprep.subr.bf16.mxu0 %v790_v1  ;;  %v795_v6 = vld [vmem:[%s901_s25 + $0xc8] sm:$0xff]   ;;  %v799_v10 = vld [vmem:[%s901_s25 + $0xd0] sm:$0xff]  }
  0x1a   : > { %v792_v3 = vld [vmem:[%s901_s25] sm:$0xff]   ;;  %743 = vmatprep.subr.bf16.mxu1 %v791_v2  ;;  %v796_v7 = vld [vmem:[%s901_s25 + $0x8] sm:$0xff]   ;;  %v800_v11 = vld [vmem:[%s901_s25 + $0x10] sm:$0xff]  }
  0x1b   : > { %v793_v4 = vld [vmem:[%s901_s25 + $0x80] sm:$0xff]   ;;  %722 = vmatpush3.bf16.msra.mxu0 %v792_v3  ;;  %v797_v8 = vld [vmem:[%s901_s25 + $0x88] sm:$0xff]   ;;  %v801_v12 = vld [vmem:[%s901_s25 + $0x90] sm:$0xff]  }
  0x1c   : > { %744 = vmatpush3.bf16.msra.mxu1 %v793_v4  ;;  %723 = vmatprep.subr.bf16.mxu0 %v794_v5  ;;  %v802_v13 = vld [vmem:[%s901_s25 + $0x58] sm:$0xff]   ;;  %v806_v17 = vld [vmem:[%s901_s25 + $0x60] sm:$0xff]   ;;  %v810_v21 = vld [vmem:[%s901_s25 + $0x68] sm:$0xff]  }
  0x1d   : > { %745 = vmatprep.subr.bf16.mxu1 %v795_v6  ;;  %v803_v14 = vld [vmem:[%s901_s25 + $0xd8] sm:$0xff]   ;;  %v807_v18 = vld [vmem:[%s901_s25 + $0xe0] sm:$0xff]   ;;  %v811_v22 = vld [vmem:[%s901_s25 + $0xe8] sm:$0xff]  }
  0x1e   : > { %v804_v15 = vld [vmem:[%s901_s25 + $0x18] sm:$0xff]   ;;  %v808_v19 = vld [vmem:[%s901_s25 + $0x20] sm:$0xff]   ;;  %v812_v23 = vld [vmem:[%s901_s25 + $0x28] sm:$0xff]  }
  0x1f   : > { %724 = vmatpush3.bf16.msra.mxu0 %v796_v7  ;;  %v805_v16 = vld [vmem:[%s901_s25 + $0x98] sm:$0xff]   ;;  %v809_v20 = vld [vmem:[%s901_s25 + $0xa0] sm:$0xff]   ;;  %v813_v24 = vld [vmem:[%s901_s25 + $0xa8] sm:$0xff]  }
  0x20   : > { %746 = vmatpush3.bf16.msra.mxu1 %v797_v8  ;;  %725 = vmatprep.subr.bf16.mxu0 %v798_v9  ;;  %v814_v25 = vld [vmem:[%s901_s25 + $0x70] sm:$0xff]   ;;  %v818_v29 = vld [vmem:[%s901_s25 + $0x78] sm:$0xff]   ;;  %v226_v33 = vld [vmem:[%s896_s21] sm:$0xff] }
  0x21   : > { %747 = vmatprep.subr.bf16.mxu1 %v799_v10  ;;  %v815_v26 = vld [vmem:[%s901_s25 + $0xf0] sm:$0xff]   ;;  %v819_v30 = vld [vmem:[%s901_s25 + $0xf8] sm:$0xff]   ;;  %v227_v34 = vld [vmem:[%s896_s21 + $0x8] sm:$0xff]  ;;  %v680_v35 = vcombine.low %v226_v33, %v226_v33  ;;  %v681_v36 = vcombine.high %v226_v33, %v226_v33 }
  0x22   : > { %v816_v27 = vld [vmem:[%s901_s25 + $0x30] sm:$0xff]   ;;  %v820_v31 = vld [vmem:[%s901_s25 + $0x38] sm:$0xff]   ;;  %v682_v37 = vcombine.low %v227_v34, %v227_v34  ;;  %v683_v38 = vcombine.high %v227_v34, %v227_v34  ;;  %v225_v47 = vld [vmem:[#allocation2] sm:$0xff] }
  0x23   : > { %726 = vmatpush3.bf16.msra.mxu0 %v800_v11  ;;  %v817_v28 = vld [vmem:[%s901_s25 + $0xb0] sm:$0xff]   ;;  %v821_v32 = vld [vmem:[%s901_s25 + $0xb8] sm:$0xff]   ;;  %530 = vmatprep.mubr.bf16.mxu0 %v681_v36  ;;  %v717_v53 = vld [vmem:[%s956_s2] ss:$0 sm:$0xff] (!%p716_p7) }
  0x24   : > { %748 = vmatpush3.bf16.msra.mxu1 %v801_v12  ;;  %727 = vmatprep.subr.bf16.mxu0 %v802_v13 }
  0x25   : > { %749 = vmatprep.subr.bf16.mxu1 %v803_v14  ;;  %570 = vmatprep.mubr.bf16.mxu1 %v683_v38 }
  0x27   : > { %728 = vmatpush3.bf16.msra.mxu0 %v804_v15 }
  0x28   : > { %750 = vmatpush3.bf16.msra.mxu1 %v805_v16  ;;  %729 = vmatprep.subr.bf16.mxu0 %v806_v17 }
  0x29   : > { %751 = vmatprep.subr.bf16.mxu1 %v807_v18 }
  0x2b   : > { %730 = vmatpush3.bf16.msra.mxu0 %v808_v19 }
  0x2c   : > { %752 = vmatpush3.bf16.msra.mxu1 %v809_v20  ;;  %731 = vmatprep.subr.bf16.mxu0 %v810_v21 }
  0x2d   : > { %753 = vmatprep.subr.bf16.mxu1 %v811_v22 }
  0x2f   : > { %732 = vmatpush3.bf16.msra.mxu0 %v812_v23 }
  0x30   : > { %754 = vmatpush3.bf16.msra.mxu1 %v813_v24  ;;  %733 = vmatprep.subr.bf16.mxu0 %v814_v25 }
  0x31   : > { %755 = vmatprep.subr.bf16.mxu1 %v815_v26 }
  0x33   : > { %734 = vmatpush3.bf16.msra.mxu0 %v816_v27 }
  0x34   : > { %756 = vmatpush3.bf16.msra.mxu1 %v817_v28  ;;  %735 = vmatprep.subr.bf16.mxu0 %v818_v29 }
  0x35   : > { %757 = vmatprep.subr.bf16.mxu1 %v819_v30 }
  0x37   : > { %736 = vmatpush3.bf16.msra.mxu0 %v820_v31 }
  0x38   : > { %758 = vmatpush3.bf16.msra.mxu1 %v821_v32 }
  0x3a   : > { %531 = vmatmul.mubr.bf16.vlgmr.msra.gmra.mrb[0].mxu0 %v680_v35 }
  0x3b   : > { %571 = vmatmul.mubr.bf16.vlgmr.msra.gmra.mrb[0].mxu1 %v682_v37 }
 0x10d   : > { %v737_v39 = vpop.f32.mrb[0].mxu0 }
 0x10e   : > { %v759_v40 = vpop.f32.mrb[0].mxu1  ;;  %v738_v41 = vpop.f32.mrb[1].mxu0 }
 0x10f   : > { %v760_v42 = vpop.f32.mrb[1].mxu1  ;;  %v739_v43 = vadd.f32 %v738_v41, %v737_v39  ;;  %v740_v45 = vpop.f32.mrb[2].mxu0 }
 0x110   : > { %v761_v44 = vadd.f32 %v760_v42, %v759_v40  ;;  %v762_v46 = vpop.f32.mrb[2].mxu1  ;;  %v741_v48 = vpop.f32.mrb[3].mxu0  ;;  %583 = sbr.rel (%p716_p7) target bundleno = 289 (0x121), region = 40 }
 0x111   : > { %v763_v49 = vpop.f32.mrb[3].mxu1 }
 0x112   : > { %v573_v50 = vadd.f32 %v761_v44, %v739_v43 }
 0x114   : > { %v578_v51 = vadd.f32 %v573_v50, %v225_v47 }
 0x116   : > { %579 = vst [vmem:[#allocation2] sm:$0xff] %v578_v51 }
 0x11d   : > { %v584_v52 = vld [vmem:[#allocation2] sm:$0xff] }
 0x11e   : > { %v592_v54 = vadd.f32 %v717_v53, %v584_v52 }
 0x120   : > { %593 = vst [vmem:[%s957_s3] sm:$0xff] %v592_v54 }
 0x121 PF: > { %s13_s14 = sadd.s32 1, %s848_s14   ;;  %s958_s12 = smov %s844_s13 }
 0x122   : > { %p10_p8 = scmp.ge.s32.totalorder %s13_s14, 4   ;;  %s959_s13 = smov %s961_s15 }
 0x124   :  { %12 = sbr.rel (!%p10_p8) target bundleno = 2 (0x2), region = 73 }

</bundles_post_ra>
